<compile_context>
chip_gen: v7x
topology: tpu7x:2x2x1
jax: 0.10.0
libtpu: 0.0.40
codegen_flags: <defaults>
</compile_context>

<pallas_src>
import numpy as np

import jax
import jax.numpy as jnp
from jax.experimental import pallas as pl
from jax.experimental.pallas import tpu as pltpu

_TB = 8  # images per grid step (= one full sublane tile)


# ---------------------------------------------------------------------------
# The fused Pallas kernel
# ---------------------------------------------------------------------------
def _net_fwd_kernel(x_ref, w1_ref, b1_ref, w2_ref, b2_ref,
                    fw1_ref, fb1_ref, fw2_ref, fb2_ref, out_ref):
    """Whole Net forward for one tile of _TB images, entirely in VMEM.

    x_ref: [28, _TB, 28]  (image row, batch, image col)
    Conv matmul output columns encode (channel, x) as
        col = (x % 2)*128 + oc*stride + x//2
    so the horizontal 2x2 pool is just max(cols[:128], cols[128:]); the
    vertical pool is a max over adjacent (row, batch) slabs.
    """
    f32 = jnp.float32

    # ---- stage 1: conv1 (1->10 ch, 5x5) as 5 row-banded MXU matmuls,
    #      + bias, 2x2 max-pool, ReLU ----------------------------------------
    acc1 = jnp.zeros((24 * _TB, 256), f32)            # rows = (y, b)
    for kh in range(5):
        lhs = x_ref[pl.ds(kh, 24), :, :].reshape(24 * _TB, 28)
        acc1 = acc1 + jnp.dot(lhs, w1_ref[kh], preferred_element_type=f32)
    acc1 = acc1 + b1_ref[...]
    xp1 = jnp.maximum(acc1[:, :128], acc1[:, 128:])   # horizontal pool [192,128]
    xp1 = xp1.reshape(12, 2, _TB, 128)                # tile-aligned slab split
    h1 = jnp.maximum(jnp.maximum(xp1[:, 0], xp1[:, 1]), 0.0)   # [12, _TB, 128]
    # h1 lanes: ic*12 + x (ic<10, x<12); lanes >=120 are zero.

    # ---- stage 2: conv2 (10->20 ch, 5x5), same scheme -----------------------
    # TODO(synk): Dropout2d on the conv2 output is identity (inference mode).
    acc2 = jnp.zeros((8 * _TB, 256), f32)             # rows = (y2, b)
    for kh in range(5):
        lhs = h1[kh:kh + 8].reshape(8 * _TB, 128)
        acc2 = acc2 + jnp.dot(lhs, w2_ref[kh], preferred_element_type=f32)
    acc2 = acc2 + b2_ref[...]
    xp2 = jnp.maximum(acc2[:, :128], acc2[:, 128:])   # [64, 128]
    xp2 = xp2.reshape(4, 2, _TB, 128)
    h2 = jnp.maximum(jnp.maximum(xp2[:, 0], xp2[:, 1]), 0.0)   # [4, _TB, 128]
    # h2 lanes: oc2*4 + x2 (oc2<20, x2<4); lanes >=80 are zero.

    # ---- fc1 + ReLU: torch's .view(-1, 320) flatten is folded into the four
    #      per-row weight slices, so no data reshuffle is needed --------------
    z = jnp.zeros((_TB, 64), f32)
    for r in range(4):
        z = z + jnp.dot(h2[r], fw1_ref[r], preferred_element_type=f32)
    z = jnp.maximum(z + fb1_ref[...], 0.0)            # [_TB, 64] (cols>=50 are 0)
    # TODO(synk): F.dropout after fc1 is identity (inference mode).

    # ---- fc2 + log_softmax --------------------------------------------------
    y = jnp.dot(z, fw2_ref[...], preferred_element_type=f32) + fb2_ref[...]
    m = jnp.max(y, axis=-1, keepdims=True)
    lse = m + jnp.log(jnp.sum(jnp.exp(y - m), axis=-1, keepdims=True))
    out_ref[...] = y - lse


# ---------------------------------------------------------------------------
# Wrapper: one pallas_call, gridded over batch tiles
# ---------------------------------------------------------------------------
def net_forward(params, x):
    """x: [B, 1, 28, 28] float32 (NCHW, like PyTorch) -> [B, 10] log-probs."""
    B = x.shape[0]
    assert x.shape[1:] == (1, 28, 28)
    bpad = ((B + _TB - 1) // _TB) * _TB

    # [B,1,28,28] -> [28, Bpad, 28]: image rows lead, batch is the sublane dim.
    xt = jnp.transpose(x.reshape(B, 28, 28), (1, 0, 2))
    if bpad != B:
        xt = jnp.pad(xt, ((0, 0), (0, bpad - B), (0, 0)))

    def _full(a):
        nd = a.ndim
        return pl.BlockSpec(a.shape, lambda i: (0,) * nd)

    args = (xt, params["w1b"], params["b1p"], params["w2b"], params["b2p"],
            params["fc1wp"], params["fc1bp"], params["fc2wp"], params["fc2bp"])

    out = pl.pallas_call(
        _net_fwd_kernel,
        out_shape=jax.ShapeDtypeStruct((bpad, 10), jnp.float32),
        grid_spec=pltpu.PrefetchScalarGridSpec(
            num_scalar_prefetch=0,
            grid=(bpad // _TB,),
            in_specs=[pl.BlockSpec((28, _TB, 28), lambda i: (0, i, 0))]
                     + [_full(a) for a in args[1:]],
            out_specs=pl.BlockSpec((_TB, 10), lambda i: (i, 0)),
        ),
        compiler_params=pltpu.CompilerParams(
            dimension_semantics=("parallel",),
            vmem_limit_bytes=32 * 1024 * 1024),
    )(*args)
    return out[:B]


# ---------------------------------------------------------------------------
# One-time weight repacking (PyTorch layout -> kernel layout)
# ---------------------------------------------------------------------------
def prepare_params(raw):
    w1 = np.asarray(raw["conv1_w"], np.float32)
    b1 = np.asarray(raw["conv1_b"], np.float32)
    w2 = np.asarray(raw["conv2_w"], np.float32)
    b2 = np.asarray(raw["conv2_b"], np.float32)
    fw1 = np.asarray(raw["fc1_w"], np.float32)
    fb1 = np.asarray(raw["fc1_b"], np.float32)
    fw2 = np.asarray(raw["fc2_w"], np.float32)
    fb2 = np.asarray(raw["fc2_b"], np.float32)

    # conv1 -> 5 row-banded matrices [28 input cols, 256 lanes].
    w1b = np.zeros((5, 28, 256), np.float32)
    b1p = np.zeros((1, 256), np.float32)
    for oc in range(10):
        for x in range(24):
            c = (x % 2) * 128 + oc * 12 + x // 2
            b1p[0, c] = b1[oc]
            for kh in range(5):
                for kw in range(5):
                    w1b[kh, x + kw, c] = w1[oc, 0, kh, kw]

    # conv2 -> 5 row-banded matrices [128 input lanes (ic*12 + x), 256 lanes].
    w2b = np.zeros((5, 128, 256), np.float32)
    b2p = np.zeros((1, 256), np.float32)
    for oc in range(20):
        for x in range(8):
            c = (x % 2) * 128 + oc * 4 + x // 2
            b2p[0, c] = b2[oc]
            for ic in range(10):
                for kh in range(5):
                    for kw in range(5):
                        w2b[kh, ic * 12 + x + kw, c] = w2[oc, ic, kh, kw]

    # fc1 -> 4 slices [128 input lanes (oc2*4 + x2), 64 lanes], one per pooled
    # row y2; this folds torch's channel-major .view(-1, 320) flatten.
    fw1p = np.zeros((4, 128, 64), np.float32)
    fb1p = np.zeros((1, 64), np.float32)
    fb1p[0, :50] = fb1
    for j in range(50):
        for oc in range(20):
            for y in range(4):
                for x in range(4):
                    fw1p[y, oc * 4 + x, j] = fw1[j, oc * 16 + y * 4 + x]

    # fc2 -> pre-transposed [64, 10] (rows >= 50 are zero padding).
    fw2p = np.zeros((64, 10), np.float32)
    fw2p[:50, :] = fw2.T
    fb2p = fb2.reshape(1, 10)

    pre = dict(w1b=w1b, b1p=b1p, w2b=w2b, b2p=b2p,
               fc1wp=fw1p, fc1bp=fb1p, fc2wp=fw2p, fc2bp=fb2p)
    return {k: jnp.asarray(v) for k, v in pre.items()}


# ---------------------------------------------------------------------------
# Deterministic PyTorch-like parameter init (uniform(-1/sqrt(fan_in), ...))
# ---------------------------------------------------------------------------
def init_raw_params(key):
    def uniform(k, shape, fan_in):
        bound = 1.0 / float(fan_in) ** 0.5
        return jax.random.uniform(k, shape, jnp.float32, -bound, bound)

    ks = jax.random.split(key, 8)
    return {
        "conv1_w": uniform(ks[0], (10, 1, 5, 5), 25),
        "conv1_b": uniform(ks[1], (10,), 25),
        "conv2_w": uniform(ks[2], (20, 10, 5, 5), 250),
        "conv2_b": uniform(ks[3], (20,), 250),
        "fc1_w": uniform(ks[4], (50, 320), 320),
        "fc1_b": uniform(ks[5], (50,), 320),
        "fc2_w": uniform(ks[6], (10, 50), 50),
        "fc2_b": uniform(ks[7], (10,), 50),
    }


# ---------------------------------------------------------------------------
# Pure-JAX reference (im2col formulation, torch-equivalent) for a self-check
# ---------------------------------------------------------------------------
def _im2col_ref(x, k):
    B, C, H, W = x.shape
    Ho, Wo = H - k + 1, W - k + 1
    cols = [x[:, :, i:i + Ho, j:j + Wo] for i in range(k) for j in range(k)]
    p = jnp.stack(cols, axis=2).transpose(0, 3, 4, 1, 2)
    return p.reshape(B * Ho * Wo, C * k * k), Ho, Wo


def _conv2d_ref(x, w, b):
    B = x.shape[0]
    O, C, k, _ = w.shape
    p, Ho, Wo = _im2col_ref(x, k)
    out = jnp.matmul(p, w.reshape(O, C * k * k).T,
                     precision=jax.lax.Precision.HIGHEST) + b
    return out.reshape(B, Ho, Wo, O).transpose(0, 3, 1, 2)


def _pool_relu_ref(x):
    m = jnp.maximum(jnp.maximum(x[:, :, 0::2, 0::2], x[:, :, 0::2, 1::2]),
                    jnp.maximum(x[:, :, 1::2, 0::2], x[:, :, 1::2, 1::2]))
    return jnp.maximum(m, 0.0)


def net_forward_ref(raw, x):
    h = _pool_relu_ref(_conv2d_ref(x, raw["conv1_w"], raw["conv1_b"]))
    h = _pool_relu_ref(_conv2d_ref(h, raw["conv2_w"], raw["conv2_b"]))
    h = h.reshape(h.shape[0], 320)
    h = jnp.maximum(jnp.matmul(h, raw["fc1_w"].T,
                               precision=jax.lax.Precision.HIGHEST)
                    + raw["fc1_b"], 0.0)
    y = jnp.matmul(h, raw["fc2_w"].T,
                   precision=jax.lax.Precision.HIGHEST) + raw["fc2_b"]
    m = jnp.max(y, axis=1, keepdims=True)
    return y - m - jnp.log(jnp.sum(jnp.exp(y - m), axis=1, keepdims=True))


if __name__ == "__main__":
    key = jax.random.PRNGKey(0)
    pkey, xkey = jax.random.split(key)
    raw = init_raw_params(pkey)
    params = prepare_params(raw)

    # MNIST-shaped input: 28x28, 1 channel (required for the 320-dim flatten).
    x = jax.random.normal(xkey, (2, 1, 28, 28), jnp.float32)

    out = jax.jit(net_forward)(params, x)
    out = jax.block_until_ready(out)
    assert out.shape == (2, 10)

    ref = jax.block_until_ready(jax.jit(net_forward_ref)(raw, x))
    assert bool(jnp.all(jnp.isfinite(out)))
    max_err = float(jnp.max(jnp.abs(out - ref)))
    assert max_err < 2e-2, max_err

    print("KERNEL_OK")
</pallas_src>

<mosaic_0001>
module attributes {stable_mosaic.version = 11 : i64} {
  func.func @_net_fwd_kernel(%arg0: i32, %arg1: memref<28x8x28xf32, #tpu.memory_space<vmem>>, %arg2: memref<5x28x256xf32, #tpu.memory_space<vmem>>, %arg3: memref<1x256xf32, #tpu.memory_space<vmem>>, %arg4: memref<5x128x256xf32, #tpu.memory_space<vmem>>, %arg5: memref<1x256xf32, #tpu.memory_space<vmem>>, %arg6: memref<4x128x64xf32, #tpu.memory_space<vmem>>, %arg7: memref<1x64xf32, #tpu.memory_space<vmem>>, %arg8: memref<64x10xf32, #tpu.memory_space<vmem>>, %arg9: memref<1x10xf32, #tpu.memory_space<vmem>>, %arg10: memref<8x10xf32, #tpu.memory_space<vmem>>) attributes {dimension_semantics = [#tpu.dimension_semantics<parallel>], iteration_bounds = array<i64: 1>, scalar_prefetch = 0 : i64, scratch_operands = 0 : i64, tpu.core_type = #tpu.core_type<tc>, window_params = [{transform_indices = @transform_0, window_bounds = array<i64: 28, 8, 28>}, {pipeline_mode = #tpu.pipeline_mode<synchronous>, transform_indices = @transform_1, window_bounds = array<i64: 5, 28, 256>}, {pipeline_mode = #tpu.pipeline_mode<synchronous>, transform_indices = @transform_2, window_bounds = array<i64: 1, 256>}, {pipeline_mode = #tpu.pipeline_mode<synchronous>, transform_indices = @transform_3, window_bounds = array<i64: 5, 128, 256>}, {pipeline_mode = #tpu.pipeline_mode<synchronous>, transform_indices = @transform_4, window_bounds = array<i64: 1, 256>}, {pipeline_mode = #tpu.pipeline_mode<synchronous>, transform_indices = @transform_5, window_bounds = array<i64: 4, 128, 64>}, {pipeline_mode = #tpu.pipeline_mode<synchronous>, transform_indices = @transform_6, window_bounds = array<i64: 1, 64>}, {pipeline_mode = #tpu.pipeline_mode<synchronous>, transform_indices = @transform_7, window_bounds = array<i64: 64, 10>}, {pipeline_mode = #tpu.pipeline_mode<synchronous>, transform_indices = @transform_8, window_bounds = array<i64: 1, 10>}, {transform_indices = @transform_9, window_bounds = array<i64: 8, 10>}]} {
    %cst = arith.constant 0.000000e+00 : f32
    %0 = vector.broadcast %cst : f32 to vector<192x256xf32>
    %c0 = arith.constant 0 : index
    %c0_0 = arith.constant 0 : index
    %c0_1 = arith.constant 0 : index
    %1 = vector.load %arg1[%c0, %c0_0, %c0_1] : memref<28x8x28xf32, #tpu.memory_space<vmem>>, vector<24x8x28xf32>
    %2 = vector.shape_cast %1 : vector<24x8x28xf32> to vector<192x28xf32>
    %c0_2 = arith.constant 0 : index
    %c0_3 = arith.constant 0 : index
    %c0_4 = arith.constant 0 : index
    %3 = vector.load %arg2[%c0_2, %c0_3, %c0_4] : memref<5x28x256xf32, #tpu.memory_space<vmem>>, vector<1x28x256xf32>
    %4 = vector.shape_cast %3 : vector<1x28x256xf32> to vector<28x256xf32>
    %cst_5 = arith.constant dense<0.000000e+00> : vector<192x256xf32>
    %5 = tpu.matmul %2, %4, %cst_5 {dimension_numbers = #tpu.dot_dimension_numbers<[1], [0], [0], [1], [0, 0, 1, 1], [], []>} : vector<192x28xf32>, vector<28x256xf32>, vector<192x256xf32> -> vector<192x256xf32>
    %6 = arith.addf %0, %5 : vector<192x256xf32>
    %c1 = arith.constant 1 : index
    %c0_6 = arith.constant 0 : index
    %c0_7 = arith.constant 0 : index
    %7 = vector.load %arg1[%c1, %c0_6, %c0_7] : memref<28x8x28xf32, #tpu.memory_space<vmem>>, vector<24x8x28xf32>
    %8 = vector.shape_cast %7 : vector<24x8x28xf32> to vector<192x28xf32>
    %c1_8 = arith.constant 1 : index
    %c0_9 = arith.constant 0 : index
    %c0_10 = arith.constant 0 : index
    %9 = vector.load %arg2[%c1_8, %c0_9, %c0_10] : memref<5x28x256xf32, #tpu.memory_space<vmem>>, vector<1x28x256xf32>
    %10 = vector.shape_cast %9 : vector<1x28x256xf32> to vector<28x256xf32>
    %cst_11 = arith.constant dense<0.000000e+00> : vector<192x256xf32>
    %11 = tpu.matmul %8, %10, %cst_11 {dimension_numbers = #tpu.dot_dimension_numbers<[1], [0], [0], [1], [0, 0, 1, 1], [], []>} : vector<192x28xf32>, vector<28x256xf32>, vector<192x256xf32> -> vector<192x256xf32>
    %12 = arith.addf %6, %11 : vector<192x256xf32>
    %c2 = arith.constant 2 : index
    %c0_12 = arith.constant 0 : index
    %c0_13 = arith.constant 0 : index
    %13 = vector.load %arg1[%c2, %c0_12, %c0_13] : memref<28x8x28xf32, #tpu.memory_space<vmem>>, vector<24x8x28xf32>
    %14 = vector.shape_cast %13 : vector<24x8x28xf32> to vector<192x28xf32>
    %c2_14 = arith.constant 2 : index
    %c0_15 = arith.constant 0 : index
    %c0_16 = arith.constant 0 : index
    %15 = vector.load %arg2[%c2_14, %c0_15, %c0_16] : memref<5x28x256xf32, #tpu.memory_space<vmem>>, vector<1x28x256xf32>
    %16 = vector.shape_cast %15 : vector<1x28x256xf32> to vector<28x256xf32>
    %cst_17 = arith.constant dense<0.000000e+00> : vector<192x256xf32>
    %17 = tpu.matmul %14, %16, %cst_17 {dimension_numbers = #tpu.dot_dimension_numbers<[1], [0], [0], [1], [0, 0, 1, 1], [], []>} : vector<192x28xf32>, vector<28x256xf32>, vector<192x256xf32> -> vector<192x256xf32>
    %18 = arith.addf %12, %17 : vector<192x256xf32>
    %c3 = arith.constant 3 : index
    %c0_18 = arith.constant 0 : index
    %c0_19 = arith.constant 0 : index
    %19 = vector.load %arg1[%c3, %c0_18, %c0_19] : memref<28x8x28xf32, #tpu.memory_space<vmem>>, vector<24x8x28xf32>
    %20 = vector.shape_cast %19 : vector<24x8x28xf32> to vector<192x28xf32>
    %c3_20 = arith.constant 3 : index
    %c0_21 = arith.constant 0 : index
    %c0_22 = arith.constant 0 : index
    %21 = vector.load %arg2[%c3_20, %c0_21, %c0_22] : memref<5x28x256xf32, #tpu.memory_space<vmem>>, vector<1x28x256xf32>
    %22 = vector.shape_cast %21 : vector<1x28x256xf32> to vector<28x256xf32>
    %cst_23 = arith.constant dense<0.000000e+00> : vector<192x256xf32>
    %23 = tpu.matmul %20, %22, %cst_23 {dimension_numbers = #tpu.dot_dimension_numbers<[1], [0], [0], [1], [0, 0, 1, 1], [], []>} : vector<192x28xf32>, vector<28x256xf32>, vector<192x256xf32> -> vector<192x256xf32>
    %24 = arith.addf %18, %23 : vector<192x256xf32>
    %c4 = arith.constant 4 : index
    %c0_24 = arith.constant 0 : index
    %c0_25 = arith.constant 0 : index
    %25 = vector.load %arg1[%c4, %c0_24, %c0_25] : memref<28x8x28xf32, #tpu.memory_space<vmem>>, vector<24x8x28xf32>
    %26 = vector.shape_cast %25 : vector<24x8x28xf32> to vector<192x28xf32>
    %c4_26 = arith.constant 4 : index
    %c0_27 = arith.constant 0 : index
    %c0_28 = arith.constant 0 : index
    %27 = vector.load %arg2[%c4_26, %c0_27, %c0_28] : memref<5x28x256xf32, #tpu.memory_space<vmem>>, vector<1x28x256xf32>
    %28 = vector.shape_cast %27 : vector<1x28x256xf32> to vector<28x256xf32>
    %cst_29 = arith.constant dense<0.000000e+00> : vector<192x256xf32>
    %29 = tpu.matmul %26, %28, %cst_29 {dimension_numbers = #tpu.dot_dimension_numbers<[1], [0], [0], [1], [0, 0, 1, 1], [], []>} : vector<192x28xf32>, vector<28x256xf32>, vector<192x256xf32> -> vector<192x256xf32>
    %30 = arith.addf %24, %29 : vector<192x256xf32>
    %c0_30 = arith.constant 0 : index
    %c0_31 = arith.constant 0 : index
    %31 = vector.load %arg3[%c0_30, %c0_31] : memref<1x256xf32, #tpu.memory_space<vmem>>, vector<1x256xf32>
    %32 = vector.broadcast %31 : vector<1x256xf32> to vector<192x256xf32>
    %33 = arith.addf %30, %32 : vector<192x256xf32>
    %34 = vector.extract_strided_slice %33 {offsets = [0, 0], sizes = [192, 128], strides = [1, 1]} : vector<192x256xf32> to vector<192x128xf32>
    %35 = vector.extract_strided_slice %33 {offsets = [0, 128], sizes = [192, 128], strides = [1, 1]} : vector<192x256xf32> to vector<192x128xf32>
    %36 = arith.maximumf %34, %35 : vector<192x128xf32>
    %37 = vector.shape_cast %36 : vector<192x128xf32> to vector<12x2x8x128xf32>
    %38 = vector.extract_strided_slice %37 {offsets = [0, 0, 0, 0], sizes = [12, 1, 8, 128], strides = [1, 1, 1, 1]} : vector<12x2x8x128xf32> to vector<12x1x8x128xf32>
    %39 = vector.shape_cast %38 : vector<12x1x8x128xf32> to vector<12x8x128xf32>
    %40 = vector.extract_strided_slice %37 {offsets = [0, 1, 0, 0], sizes = [12, 1, 8, 128], strides = [1, 1, 1, 1]} : vector<12x2x8x128xf32> to vector<12x1x8x128xf32>
    %41 = vector.shape_cast %40 : vector<12x1x8x128xf32> to vector<12x8x128xf32>
    %42 = arith.maximumf %39, %41 : vector<12x8x128xf32>
    %cst_32 = arith.constant 0.000000e+00 : f32
    %43 = vector.broadcast %cst_32 : f32 to vector<12x8x128xf32>
    %44 = arith.maximumf %42, %43 : vector<12x8x128xf32>
    %cst_33 = arith.constant 0.000000e+00 : f32
    %45 = vector.broadcast %cst_33 : f32 to vector<64x256xf32>
    %46 = vector.extract_strided_slice %44 {offsets = [0, 0, 0], sizes = [8, 8, 128], strides = [1, 1, 1]} : vector<12x8x128xf32> to vector<8x8x128xf32>
    %47 = vector.shape_cast %46 : vector<8x8x128xf32> to vector<64x128xf32>
    %c0_34 = arith.constant 0 : index
    %c0_35 = arith.constant 0 : index
    %c0_36 = arith.constant 0 : index
    %48 = vector.load %arg4[%c0_34, %c0_35, %c0_36] : memref<5x128x256xf32, #tpu.memory_space<vmem>>, vector<1x128x256xf32>
    %49 = vector.shape_cast %48 : vector<1x128x256xf32> to vector<128x256xf32>
    %cst_37 = arith.constant dense<0.000000e+00> : vector<64x256xf32>
    %50 = tpu.matmul %47, %49, %cst_37 {dimension_numbers = #tpu.dot_dimension_numbers<[1], [0], [0], [1], [0, 0, 1, 1], [], []>} : vector<64x128xf32>, vector<128x256xf32>, vector<64x256xf32> -> vector<64x256xf32>
    %51 = arith.addf %45, %50 : vector<64x256xf32>
    %52 = vector.extract_strided_slice %44 {offsets = [1, 0, 0], sizes = [8, 8, 128], strides = [1, 1, 1]} : vector<12x8x128xf32> to vector<8x8x128xf32>
    %53 = vector.shape_cast %52 : vector<8x8x128xf32> to vector<64x128xf32>
    %c1_38 = arith.constant 1 : index
    %c0_39 = arith.constant 0 : index
    %c0_40 = arith.constant 0 : index
    %54 = vector.load %arg4[%c1_38, %c0_39, %c0_40] : memref<5x128x256xf32, #tpu.memory_space<vmem>>, vector<1x128x256xf32>
    %55 = vector.shape_cast %54 : vector<1x128x256xf32> to vector<128x256xf32>
    %cst_41 = arith.constant dense<0.000000e+00> : vector<64x256xf32>
    %56 = tpu.matmul %53, %55, %cst_41 {dimension_numbers = #tpu.dot_dimension_numbers<[1], [0], [0], [1], [0, 0, 1, 1], [], []>} : vector<64x128xf32>, vector<128x256xf32>, vector<64x256xf32> -> vector<64x256xf32>
    %57 = arith.addf %51, %56 : vector<64x256xf32>
    %58 = vector.extract_strided_slice %44 {offsets = [2, 0, 0], sizes = [8, 8, 128], strides = [1, 1, 1]} : vector<12x8x128xf32> to vector<8x8x128xf32>
    %59 = vector.shape_cast %58 : vector<8x8x128xf32> to vector<64x128xf32>
    %c2_42 = arith.constant 2 : index
    %c0_43 = arith.constant 0 : index
    %c0_44 = arith.constant 0 : index
    %60 = vector.load %arg4[%c2_42, %c0_43, %c0_44] : memref<5x128x256xf32, #tpu.memory_space<vmem>>, vector<1x128x256xf32>
    %61 = vector.shape_cast %60 : vector<1x128x256xf32> to vector<128x256xf32>
    %cst_45 = arith.constant dense<0.000000e+00> : vector<64x256xf32>
    %62 = tpu.matmul %59, %61, %cst_45 {dimension_numbers = #tpu.dot_dimension_numbers<[1], [0], [0], [1], [0, 0, 1, 1], [], []>} : vector<64x128xf32>, vector<128x256xf32>, vector<64x256xf32> -> vector<64x256xf32>
    %63 = arith.addf %57, %62 : vector<64x256xf32>
    %64 = vector.extract_strided_slice %44 {offsets = [3, 0, 0], sizes = [8, 8, 128], strides = [1, 1, 1]} : vector<12x8x128xf32> to vector<8x8x128xf32>
    %65 = vector.shape_cast %64 : vector<8x8x128xf32> to vector<64x128xf32>
    %c3_46 = arith.constant 3 : index
    %c0_47 = arith.constant 0 : index
    %c0_48 = arith.constant 0 : index
    %66 = vector.load %arg4[%c3_46, %c0_47, %c0_48] : memref<5x128x256xf32, #tpu.memory_space<vmem>>, vector<1x128x256xf32>
    %67 = vector.shape_cast %66 : vector<1x128x256xf32> to vector<128x256xf32>
    %cst_49 = arith.constant dense<0.000000e+00> : vector<64x256xf32>
    %68 = tpu.matmul %65, %67, %cst_49 {dimension_numbers = #tpu.dot_dimension_numbers<[1], [0], [0], [1], [0, 0, 1, 1], [], []>} : vector<64x128xf32>, vector<128x256xf32>, vector<64x256xf32> -> vector<64x256xf32>
    %69 = arith.addf %63, %68 : vector<64x256xf32>
    %70 = vector.extract_strided_slice %44 {offsets = [4, 0, 0], sizes = [8, 8, 128], strides = [1, 1, 1]} : vector<12x8x128xf32> to vector<8x8x128xf32>
    %71 = vector.shape_cast %70 : vector<8x8x128xf32> to vector<64x128xf32>
    %c4_50 = arith.constant 4 : index
    %c0_51 = arith.constant 0 : index
    %c0_52 = arith.constant 0 : index
    %72 = vector.load %arg4[%c4_50, %c0_51, %c0_52] : memref<5x128x256xf32, #tpu.memory_space<vmem>>, vector<1x128x256xf32>
    %73 = vector.shape_cast %72 : vector<1x128x256xf32> to vector<128x256xf32>
    %cst_53 = arith.constant dense<0.000000e+00> : vector<64x256xf32>
    %74 = tpu.matmul %71, %73, %cst_53 {dimension_numbers = #tpu.dot_dimension_numbers<[1], [0], [0], [1], [0, 0, 1, 1], [], []>} : vector<64x128xf32>, vector<128x256xf32>, vector<64x256xf32> -> vector<64x256xf32>
    %75 = arith.addf %69, %74 : vector<64x256xf32>
    %c0_54 = arith.constant 0 : index
    %c0_55 = arith.constant 0 : index
    %76 = vector.load %arg5[%c0_54, %c0_55] : memref<1x256xf32, #tpu.memory_space<vmem>>, vector<1x256xf32>
    %77 = vector.broadcast %76 : vector<1x256xf32> to vector<64x256xf32>
    %78 = arith.addf %75, %77 : vector<64x256xf32>
    %79 = vector.extract_strided_slice %78 {offsets = [0, 0], sizes = [64, 128], strides = [1, 1]} : vector<64x256xf32> to vector<64x128xf32>
    %80 = vector.extract_strided_slice %78 {offsets = [0, 128], sizes = [64, 128], strides = [1, 1]} : vector<64x256xf32> to vector<64x128xf32>
    %81 = arith.maximumf %79, %80 : vector<64x128xf32>
    %82 = vector.shape_cast %81 : vector<64x128xf32> to vector<4x2x8x128xf32>
    %83 = vector.extract_strided_slice %82 {offsets = [0, 0, 0, 0], sizes = [4, 1, 8, 128], strides = [1, 1, 1, 1]} : vector<4x2x8x128xf32> to vector<4x1x8x128xf32>
    %84 = vector.shape_cast %83 : vector<4x1x8x128xf32> to vector<4x8x128xf32>
    %85 = vector.extract_strided_slice %82 {offsets = [0, 1, 0, 0], sizes = [4, 1, 8, 128], strides = [1, 1, 1, 1]} : vector<4x2x8x128xf32> to vector<4x1x8x128xf32>
    %86 = vector.shape_cast %85 : vector<4x1x8x128xf32> to vector<4x8x128xf32>
    %87 = arith.maximumf %84, %86 : vector<4x8x128xf32>
    %cst_56 = arith.constant 0.000000e+00 : f32
    %88 = vector.broadcast %cst_56 : f32 to vector<4x8x128xf32>
    %89 = arith.maximumf %87, %88 : vector<4x8x128xf32>
    %cst_57 = arith.constant 0.000000e+00 : f32
    %90 = vector.broadcast %cst_57 : f32 to vector<8x64xf32>
    %91 = vector.extract_strided_slice %89 {offsets = [0, 0, 0], sizes = [1, 8, 128], strides = [1, 1, 1]} : vector<4x8x128xf32> to vector<1x8x128xf32>
    %92 = vector.shape_cast %91 : vector<1x8x128xf32> to vector<8x128xf32>
    %c0_58 = arith.constant 0 : index
    %c0_59 = arith.constant 0 : index
    %c0_60 = arith.constant 0 : index
    %93 = vector.load %arg6[%c0_58, %c0_59, %c0_60] : memref<4x128x64xf32, #tpu.memory_space<vmem>>, vector<1x128x64xf32>
    %94 = vector.shape_cast %93 : vector<1x128x64xf32> to vector<128x64xf32>
    %cst_61 = arith.constant dense<0.000000e+00> : vector<8x64xf32>
    %95 = tpu.matmul %92, %94, %cst_61 {dimension_numbers = #tpu.dot_dimension_numbers<[1], [0], [0], [1], [0, 0, 1, 1], [], []>} : vector<8x128xf32>, vector<128x64xf32>, vector<8x64xf32> -> vector<8x64xf32>
    %96 = arith.addf %90, %95 : vector<8x64xf32>
    %97 = vector.extract_strided_slice %89 {offsets = [1, 0, 0], sizes = [1, 8, 128], strides = [1, 1, 1]} : vector<4x8x128xf32> to vector<1x8x128xf32>
    %98 = vector.shape_cast %97 : vector<1x8x128xf32> to vector<8x128xf32>
    %c1_62 = arith.constant 1 : index
    %c0_63 = arith.constant 0 : index
    %c0_64 = arith.constant 0 : index
    %99 = vector.load %arg6[%c1_62, %c0_63, %c0_64] : memref<4x128x64xf32, #tpu.memory_space<vmem>>, vector<1x128x64xf32>
    %100 = vector.shape_cast %99 : vector<1x128x64xf32> to vector<128x64xf32>
    %cst_65 = arith.constant dense<0.000000e+00> : vector<8x64xf32>
    %101 = tpu.matmul %98, %100, %cst_65 {dimension_numbers = #tpu.dot_dimension_numbers<[1], [0], [0], [1], [0, 0, 1, 1], [], []>} : vector<8x128xf32>, vector<128x64xf32>, vector<8x64xf32> -> vector<8x64xf32>
    %102 = arith.addf %96, %101 : vector<8x64xf32>
    %103 = vector.extract_strided_slice %89 {offsets = [2, 0, 0], sizes = [1, 8, 128], strides = [1, 1, 1]} : vector<4x8x128xf32> to vector<1x8x128xf32>
    %104 = vector.shape_cast %103 : vector<1x8x128xf32> to vector<8x128xf32>
    %c2_66 = arith.constant 2 : index
    %c0_67 = arith.constant 0 : index
    %c0_68 = arith.constant 0 : index
    %105 = vector.load %arg6[%c2_66, %c0_67, %c0_68] : memref<4x128x64xf32, #tpu.memory_space<vmem>>, vector<1x128x64xf32>
    %106 = vector.shape_cast %105 : vector<1x128x64xf32> to vector<128x64xf32>
    %cst_69 = arith.constant dense<0.000000e+00> : vector<8x64xf32>
    %107 = tpu.matmul %104, %106, %cst_69 {dimension_numbers = #tpu.dot_dimension_numbers<[1], [0], [0], [1], [0, 0, 1, 1], [], []>} : vector<8x128xf32>, vector<128x64xf32>, vector<8x64xf32> -> vector<8x64xf32>
    %108 = arith.addf %102, %107 : vector<8x64xf32>
    %109 = vector.extract_strided_slice %89 {offsets = [3, 0, 0], sizes = [1, 8, 128], strides = [1, 1, 1]} : vector<4x8x128xf32> to vector<1x8x128xf32>
    %110 = vector.shape_cast %109 : vector<1x8x128xf32> to vector<8x128xf32>
    %c3_70 = arith.constant 3 : index
    %c0_71 = arith.constant 0 : index
    %c0_72 = arith.constant 0 : index
    %111 = vector.load %arg6[%c3_70, %c0_71, %c0_72] : memref<4x128x64xf32, #tpu.memory_space<vmem>>, vector<1x128x64xf32>
    %112 = vector.shape_cast %111 : vector<1x128x64xf32> to vector<128x64xf32>
    %cst_73 = arith.constant dense<0.000000e+00> : vector<8x64xf32>
    %113 = tpu.matmul %110, %112, %cst_73 {dimension_numbers = #tpu.dot_dimension_numbers<[1], [0], [0], [1], [0, 0, 1, 1], [], []>} : vector<8x128xf32>, vector<128x64xf32>, vector<8x64xf32> -> vector<8x64xf32>
    %114 = arith.addf %108, %113 : vector<8x64xf32>
    %c0_74 = arith.constant 0 : index
    %c0_75 = arith.constant 0 : index
    %115 = vector.load %arg7[%c0_74, %c0_75] : memref<1x64xf32, #tpu.memory_space<vmem>>, vector<1x64xf32>
    %116 = vector.broadcast %115 : vector<1x64xf32> to vector<8x64xf32>
    %117 = arith.addf %114, %116 : vector<8x64xf32>
    %cst_76 = arith.constant 0.000000e+00 : f32
    %118 = vector.broadcast %cst_76 : f32 to vector<8x64xf32>
    %119 = arith.maximumf %117, %118 : vector<8x64xf32>
    %c0_77 = arith.constant 0 : index
    %c0_78 = arith.constant 0 : index
    %120 = vector.load %arg8[%c0_77, %c0_78] : memref<64x10xf32, #tpu.memory_space<vmem>>, vector<64x10xf32>
    %cst_79 = arith.constant dense<0.000000e+00> : vector<8x10xf32>
    %121 = tpu.matmul %119, %120, %cst_79 {dimension_numbers = #tpu.dot_dimension_numbers<[1], [0], [0], [1], [0, 0, 1, 1], [], []>} : vector<8x64xf32>, vector<64x10xf32>, vector<8x10xf32> -> vector<8x10xf32>
    %c0_80 = arith.constant 0 : index
    %c0_81 = arith.constant 0 : index
    %122 = vector.load %arg9[%c0_80, %c0_81] : memref<1x10xf32, #tpu.memory_space<vmem>>, vector<1x10xf32>
    %123 = vector.broadcast %122 : vector<1x10xf32> to vector<8x10xf32>
    %124 = arith.addf %121, %123 : vector<8x10xf32>
    %cst_82 = arith.constant dense<0xFF800000> : vector<8xf32>
    %125 = vector.multi_reduction <maximumf>, %124, %cst_82 [1] : vector<8x10xf32> to vector<8xf32>
    %126 = vector.shape_cast %125 : vector<8xf32> to vector<8x1xf32>
    %127 = vector.broadcast %126 : vector<8x1xf32> to vector<8x10xf32>
    %128 = arith.subf %124, %127 : vector<8x10xf32>
    %129 = math.exp %128 : vector<8x10xf32>
    %cst_83 = arith.constant dense<0.000000e+00> : vector<8xf32>
    %130 = vector.multi_reduction <add>, %129, %cst_83 [1] : vector<8x10xf32> to vector<8xf32>
    %131 = vector.shape_cast %130 : vector<8xf32> to vector<8x1xf32>
    %132 = math.log %131 : vector<8x1xf32>
    %133 = arith.addf %126, %132 : vector<8x1xf32>
    %134 = vector.broadcast %133 : vector<8x1xf32> to vector<8x10xf32>
    %135 = arith.subf %124, %134 : vector<8x10xf32>
    %c0_84 = arith.constant 0 : index
    %c0_85 = arith.constant 0 : index
    %136 = vector.load %arg10[%c0_84, %c0_85] : memref<8x10xf32, #tpu.memory_space<vmem>>, vector<8x10xf32>
    tpu.vector_store %arg10[%c0_84, %c0_85], %135 {strides = array<i32>} : memref<8x10xf32, #tpu.memory_space<vmem>>, vector<8x10xf32>,
    return
  }
  func.func @transform_0(%arg0: i32) -> (i32, i32, i32) {
    %c0_i32 = arith.constant 0 : i32
    %c0_i32_0 = arith.constant 0 : i32
    %c0_i32_1 = arith.constant 0 : i32
    return %c0_i32, %arg0, %c0_i32_0 : i32, i32, i32
  }
  func.func @transform_1(%arg0: i32) -> (i32, i32, i32) {
    %c0_i32 = arith.constant 0 : i32
    %c0_i32_0 = arith.constant 0 : i32
    %c0_i32_1 = arith.constant 0 : i32
    %c0_i32_2 = arith.constant 0 : i32
    return %c0_i32, %c0_i32_0, %c0_i32_1 : i32, i32, i32
  }
  func.func @transform_2(%arg0: i32) -> (i32, i32) {
    %c0_i32 = arith.constant 0 : i32
    %c0_i32_0 = arith.constant 0 : i32
    %c0_i32_1 = arith.constant 0 : i32
    return %c0_i32, %c0_i32_0 : i32, i32
  }
  func.func @transform_3(%arg0: i32) -> (i32, i32, i32) {
    %c0_i32 = arith.constant 0 : i32
    %c0_i32_0 = arith.constant 0 : i32
    %c0_i32_1 = arith.constant 0 : i32
    %c0_i32_2 = arith.constant 0 : i32
    return %c0_i32, %c0_i32_0, %c0_i32_1 : i32, i32, i32
  }
  func.func @transform_4(%arg0: i32) -> (i32, i32) {
    %c0_i32 = arith.constant 0 : i32
    %c0_i32_0 = arith.constant 0 : i32
    %c0_i32_1 = arith.constant 0 : i32
    return %c0_i32, %c0_i32_0 : i32, i32
  }
  func.func @transform_5(%arg0: i32) -> (i32, i32, i32) {
    %c0_i32 = arith.constant 0 : i32
    %c0_i32_0 = arith.constant 0 : i32
    %c0_i32_1 = arith.constant 0 : i32
    %c0_i32_2 = arith.constant 0 : i32
    return %c0_i32, %c0_i32_0, %c0_i32_1 : i32, i32, i32
  }
  func.func @transform_6(%arg0: i32) -> (i32, i32) {
    %c0_i32 = arith.constant 0 : i32
    %c0_i32_0 = arith.constant 0 : i32
    %c0_i32_1 = arith.constant 0 : i32
    return %c0_i32, %c0_i32_0 : i32, i32
  }
  func.func @transform_7(%arg0: i32) -> (i32, i32) {
    %c0_i32 = arith.constant 0 : i32
    %c0_i32_0 = arith.constant 0 : i32
    %c0_i32_1 = arith.constant 0 : i32
    return %c0_i32, %c0_i32_0 : i32, i32
  }
  func.func @transform_8(%arg0: i32) -> (i32, i32) {
    %c0_i32 = arith.constant 0 : i32
    %c0_i32_0 = arith.constant 0 : i32
    %c0_i32_1 = arith.constant 0 : i32
    return %c0_i32, %c0_i32_0 : i32, i32
  }
  func.func @transform_9(%arg0: i32) -> (i32, i32) {
    %c0_i32 = arith.constant 0 : i32
    %c0_i32_0 = arith.constant 0 : i32
    return %arg0, %c0_i32 : i32, i32
  }
}

</mosaic_0001>

<bundles_post_ra>
// kernel: net_forward.1
= control target key start
LH: loop header
LB: loop body
LE: loop exit
PB: predicated region body
PF: predicated region fallthrough
CT: control target
= control target key end

     0   :  { %14 = vsyncpa [#allocation3], 0  ;;  %s4345_s30 = smov [#allocation2]   ;;  %s5654_s0 = inlined_call_operand.vmem [shape: f32[28,8,28], index: 0, kind: input, shape index: {}]   ;;  %s5655_s1 = inlined_call_operand.vmem [shape: f32[5,28,256], index: 1, kind: input, shape index: {}]   ;;  %s5656_s2 = inlined_call_operand.vmem [shape: f32[1,256], index: 2, kind: input, shape index: {}]   ;;  %s5657_s3 = inlined_call_operand.hbm [shape: f32[5,128,256], index: 3, kind: input, shape index: {}]   ;;  %s5658_s4 = inlined_call_operand.vmem [shape: f32[1,256], index: 4, kind: input, shape index: {}]   ;;  %s5659_s5 = inlined_call_operand.vmem [shape: f32[4,128,64], index: 5, kind: input, shape index: {}]   ;;  %s5660_s6 = inlined_call_operand.vmem [shape: f32[1,64], index: 6, kind: input, shape index: {}]   ;;  %s5661_s7 = inlined_call_operand.vmem [shape: f32[64,10], index: 7, kind: input, shape index: {}]   ;;  %s5662_s8 = inlined_call_operand.vmem [shape: f32[1,10], index: 8, kind: input, shape index: {}]   ;;  %s5663_s9 = inlined_call_operand.vmem [shape: f32[8,10], index: 9, kind: output, shape index: {}]  }
   0x1   :  { %s26_s10 = sshll.u32 %s4345_s30, 4  ;;  %s4321_s13 = scalar_lea.hbm %s5657_s3, 20480  ;;  %s27_s10 = int_to_ptr.vmem [resolvable:$true] %s26_s10 }
   0x2   :  { %p4322_p0 = scmp.ne.s32.totalorder %s5657_s3, %s4321_s13  ;;  %p4325_p1 = scmp.lt.u32.totalorder %s4321_s13, %s5657_s3 }
   0x4   :  { %p4327_p2 = pnand %p4325_p1, %p4322_p0 }
   0x6   :  { %4330 = shalt.err (!%p4327_p2)
}
   0x7   :  { %s4331_s18 = scalar_lea.vmem %s27_s10, 20480  ;;  %p4336_p4 = scmp.lt.s32.totalorder %s27_s10, %s27_s10 }
   0x8   :  { %p4332_p3 = scmp.ne.s32.totalorder %s27_s10, %s4331_s18  ;;  %p4337_p5 = scmp.lt.s32.totalorder %s4331_s18, %s4331_s18 }
   0xa   :  { %p4338_p6 = por %p4337_p5, %p4336_p4 }
   0xc   :  { %p4339_p7 = pnand %p4338_p6, %p4332_p3 }
   0xe   :  { %4342 = shalt.err (!%p4339_p7)
}
   0xf   :  { %s4346_s19 = smov 256   ;;  %s4347_s20 = smov 16  }
  0x10   :  { %32 = dma.hbm_to_vmem [thread:$0]  %s5657_s3, 20480, %s27_s10, [#allocation3], %s4346_s19, %s4346_s19, %s4347_s20  }
  0x11   :  { %4343 = dma.done.wait [#allocation3], 20480  }
  0x12   :  { %4344 = vsyncadd [#allocation3], 4294946816  ;;  %v5665_v0 = vmov 0.0   ;;  %vm185_vm0 = vcmask 1043456   ;;  %v71_v1 = vld [vmem:[%s5655_s1 + $0x8] sm:$0xff]  ;;  %v73_v2 = vld [vmem:[%s5655_s1 + $0x18] sm:$0xff] }
  0x13   :  { %543 = vmatprep.mubr.f32.mxu0 %v5665_v0  ;;  %256 = vmatprep.mubr.f32.mxu1 %v5665_v0  ;;  %v70_v3 = vld [vmem:[%s5655_s1] sm:$0xff]  ;;  %v3746_v4 = vpack.c.bf16 %v73_v2, %v71_v1  ;;  %v72_v5 = vld [vmem:[%s5655_s1 + $0x10] sm:$0xff]  ;;  %v75_v6 = vld [vmem:[%s5655_s1 + $0x28] sm:$0xff]  ;;  %vm4349_vm1 = vmmov 1   ;;  %vm112_vm3 = vcmask 228352   ;;  %vm4351_vm4 = vmmov 0  }
  0x14   :  { %v77_v7 = vld [vmem:[%s5655_s1 + $0x38] sm:$0xf]  ;;  %v3748_v8 = vpack.c.bf16 %v72_v5, %v70_v3  ;;  %vm4434_vm2 = vmpackc.low %vm185_vm0, %vm4349_vm1  ;;  %v74_v11 = vld [vmem:[%s5655_s1 + $0x20] sm:$0xff]  ;;  %vm3097_vm5 = vcmask 523264   ;;  %vm3171_vm6 = vcmask 80896  }
  0x15   :  { %v3750_v10 = vpack.c.bf16 %v77_v7, %v75_v6  ;;  %v76_v12 = vld [vmem:[%s5655_s1 + $0x30] sm:$0xf]  ;;  %3747 = vmatprep.subr.bf16.mxu0 %v3746_v4  ;;  %v3300_v13 = vld [vmem:[%s5655_s1 + $0x88] sm:$0xff]  ;;  %v3302_v14 = vld [vmem:[%s5655_s1 + $0x98] sm:$0xff] }
  0x16   :  { %3749 = vmatpush1.bf16.msra.mxu0 %v3748_v8  ;;  %v3753_v15 = vpack.c.bf16 %v76_v12, %v74_v11  ;;  %v3756_v16 = vpack.c.bf16 %v3302_v14, %v3300_v13  ;;  %v3299_v17 = vld [vmem:[%s5655_s1 + $0x80] sm:$0xff]  ;;  %v3301_v18 = vld [vmem:[%s5655_s1 + $0x90] sm:$0xff]  ;;  %v3304_v21 = vld [vmem:[%s5655_s1 + $0xa8] sm:$0xff] }
  0x17   :  { %3752 = vmatprep.subr.msk.bf16.mxu0 %vm4434_vm2, %v3750_v10  ;;  %v46_v19 = vld [vmem:[%s5654_s0] sm:$0xff]  ;;  %v3758_v20 = vpack.c.bf16 %v3301_v18, %v3299_v17  ;;  %v3306_v22 = vld [vmem:[%s5655_s1 + $0xb8] sm:$0xf]  ;;  %v3305_v25 = vld [vmem:[%s5655_s1 + $0xb0] sm:$0xf] }
  0x18   :  { %v3760_v23 = vpack.c.bf16 %v3306_v22, %v3304_v21  ;;  %v3303_v24 = vld [vmem:[%s5655_s1 + $0xa0] sm:$0xff]  ;;  %v4480_v26 = vld [vmem:[%s5654_s0 + $0x8] sm:$0xff]  ;;  %v3360_v29 = vld [vmem:[%s5655_s1 + $0xd8] sm:$0xff] }
  0x19   :  { %v3763_v27 = vpack.c.bf16 %v3305_v25, %v3303_v24  ;;  %v3358_v28 = vld [vmem:[%s5655_s1 + $0xc8] sm:$0xff]  ;;  %v4496_v31 = vld [vmem:[%s5654_s0 + $0x10] sm:$0xff]  ;;  %v4506_v32 = vld [vmem:[%s5654_s0 + $0x18] sm:$0xff] }
  0x1a   :  { %3755 = vmatpush1.bf16.msk.msra.mxu0 %vm4434_vm2, %v3753_v15  ;;  %v3766_v30 = vpack.c.bf16 %v3360_v29, %v3358_v28  ;;  %v4514_v33 = vld [vmem:[%s5654_s0 + $0x20] sm:$0xff]  ;;  %v4522_v34 = vld [vmem:[%s5654_s0 + $0x28] sm:$0xff]  ;;  %v4530_v35 = vld [vmem:[%s5654_s0 + $0x30] sm:$0xff] }
  0x1b   :  { %3757 = vmatprep.subr.bf16.mxu0 %v3756_v16  ;;  %v4538_v36 = vld [vmem:[%s5654_s0 + $0x38] sm:$0xff]  ;;  %v4546_v37 = vld [vmem:[%s5654_s0 + $0x40] sm:$0xff]  ;;  %v4554_v38 = vld [vmem:[%s5654_s0 + $0x48] sm:$0xff] }
  0x1c   :  { %v4562_v39 = vld [vmem:[%s5654_s0 + $0x50] sm:$0xff]  ;;  %v4570_v40 = vld [vmem:[%s5654_s0 + $0x58] sm:$0xff]  ;;  %v4578_v41 = vld [vmem:[%s5654_s0 + $0x60] sm:$0xff] }
  0x1d   :  { %3251 = vmatmul.mubr.msk.f32.vlgmr.msra.gmra.mrb[0].mxu0 %vm112_vm3, %v46_v19  ;;  %v4586_v42 = vld [vmem:[%s5654_s0 + $0x68] sm:$0xff]  ;;  %v4594_v43 = vld [vmem:[%s5654_s0 + $0x70] sm:$0xff]  ;;  %v4602_v44 = vld [vmem:[%s5654_s0 + $0x78] sm:$0xff] }
  0x1e   :  { %3759 = vmatpush1.bf16.msra.mxu0 %v3758_v20  ;;  %549 = vmatprep.mubr.f32.mxu0 %v5665_v0  ;;  %v4610_v45 = vld [vmem:[%s5654_s0 + $0x80] sm:$0xff]  ;;  %v4618_v46 = vld [vmem:[%s5654_s0 + $0x88] sm:$0xff]  ;;  %v4626_v47 = vld [vmem:[%s5654_s0 + $0x90] sm:$0xff] }
  0x1f   :  { %3762 = vmatprep.subr.msk.bf16.mxu0 %vm4434_vm2, %v3760_v23  ;;  %v4634_v48 = vld [vmem:[%s5654_s0 + $0x98] sm:$0xff]  ;;  %v4642_v49 = vld [vmem:[%s5654_s0 + $0xa0] sm:$0xff]  ;;  %v4650_v50 = vld [vmem:[%s5654_s0 + $0xa8] sm:$0xff] }
  0x20   :  { %v4658_v51 = vld [vmem:[%s5654_s0 + $0xb0] sm:$0xff]  ;;  %v4666_v52 = vld [vmem:[%s5654_s0 + $0xb8] sm:$0xff]  ;;  %v3357_v53 = vld [vmem:[%s5655_s1 + $0xc0] sm:$0xff] }
  0x21   :  { %3252 = vmatmul.mubr.msk.f32.gmra.mrb[2].mxu0 %vm112_vm3, %v4480_v26  ;;  %v3359_v54 = vld [vmem:[%s5655_s1 + $0xd0] sm:$0xff]  ;;  %v3362_v55 = vld [vmem:[%s5655_s1 + $0xe8] sm:$0xff]  ;;  %v3364_v56 = vld [vmem:[%s5655_s1 + $0xf8] sm:$0xf] }
  0x22   :  { %555 = vmatprep.mubr.f32.mxu0 %v5665_v0  ;;  %3765 = vmatpush1.bf16.msk.msra.mxu0 %vm4434_vm2, %v3763_v27  ;;  %v3768_v57 = vpack.c.bf16 %v3359_v54, %v3357_v53  ;;  %v3770_v58 = vpack.c.bf16 %v3364_v56, %v3362_v55  ;;  %v3361_v59 = vld [vmem:[%s5655_s1 + $0xe0] sm:$0xff]  ;;  %v3363_v60 = vld [vmem:[%s5655_s1 + $0xf0] sm:$0xf]  ;;  %v3416_v61 = vld [vmem:[%s5655_s1 + $0x108] sm:$0xff] }
  0x23   :  { %3767 = vmatprep.subr.bf16.mxu0 %v3766_v30  ;;  %v3418_v62 = vld [vmem:[%s5655_s1 + $0x118] sm:$0xff]  ;;  %v3773_v63 = vpack.c.bf16 %v3363_v60, %v3361_v59  ;;  %v3216_v2 = vld [vmem:[%s5655_s1 + $0x48] sm:$0xff]  ;;  %v3215_v5 = vld [vmem:[%s5655_s1 + $0x40] sm:$0xff] }
  0x24   :  { %v3776_v1 = vpack.c.bf16 %v3418_v62, %v3416_v61  ;;  %v3218_v3 = vld [vmem:[%s5655_s1 + $0x58] sm:$0xff]  ;;  %v3217_v6 = vld [vmem:[%s5655_s1 + $0x50] sm:$0xff]  ;;  %v3220_v8 = vld [vmem:[%s5655_s1 + $0x68] sm:$0xff] }
  0x25   :  { %3253 = vmatmul.mubr.msk.f32.gmra.mrb[4].mxu0 %vm112_vm3, %v4496_v31  ;;  %v3736_v4 = vpack.c.bf16 %v3218_v3, %v3216_v2  ;;  %v3738_v7 = vpack.c.bf16 %v3217_v6, %v3215_v5  ;;  %v3222_v10 = vld [vmem:[%s5655_s1 + $0x78] sm:$0xf]  ;;  %v3219_v12 = vld [vmem:[%s5655_s1 + $0x60] sm:$0xff]  ;;  %v3221_v13 = vld [vmem:[%s5655_s1 + $0x70] sm:$0xf] }
  0x26   :  { %561 = vmatprep.mubr.f32.mxu0 %v5665_v0  ;;  %v3740_v11 = vpack.c.bf16 %v3222_v10, %v3220_v8  ;;  %v3743_v14 = vpack.c.bf16 %v3221_v13, %v3219_v12  ;;  %v4814_v15 = vld [vmem:[%s5654_s0 + $0xc0] sm:$0xff]  ;;  %v4825_v16 = vld [vmem:[%s5654_s0 + $0xc8] sm:$0xff]  ;;  %v3417_v18 = vld [vmem:[%s5655_s1 + $0x110] sm:$0xff] }
  0x27   :  { %3737 = vmatprep.subr.bf16.mxu1 %v3736_v4  ;;  %v3415_v17 = vld [vmem:[%s5655_s1 + $0x100] sm:$0xff]  ;;  %v3420_v19 = vld [vmem:[%s5655_s1 + $0x128] sm:$0xff]  ;;  %v3422_v20 = vld [vmem:[%s5655_s1 + $0x138] sm:$0xf] }
  0x28   :  { %3739 = vmatpush1.bf16.msra.mxu1 %v3738_v7  ;;  %v3778_v21 = vpack.c.bf16 %v3417_v18, %v3415_v17  ;;  %v3780_v22 = vpack.c.bf16 %v3422_v20, %v3420_v19  ;;  %v3419_v23 = vld [vmem:[%s5655_s1 + $0x120] sm:$0xff]  ;;  %v3421_v24 = vld [vmem:[%s5655_s1 + $0x130] sm:$0xf]  ;;  %v1937_v9 = vld [vmem:[#allocation2 + $0x108] sm:$0xff] }
  0x29   :  { %3254 = vmatmul.mubr.msk.f32.gmra.mrb[6].mxu0 %vm112_vm3, %v4506_v32  ;;  %3742 = vmatprep.subr.msk.bf16.mxu1 %vm4434_vm2, %v3740_v11  ;;  %v3783_v25 = vpack.c.bf16 %v3421_v24, %v3419_v23  ;;  %v1936_v27 = vld [vmem:[#allocation2 + $0x100] sm:$0xff]  ;;  %v1938_v29 = vld [vmem:[#allocation2 + $0x110] sm:$0xff]  ;;  %v1941_v30 = vld [vmem:[#allocation2 + $0x128] sm:$0xff] }
  0x2a   :  { %567 = vmatprep.mubr.f32.mxu0 %v5665_v0  ;;  %v1940_v54 = vld [vmem:[#allocation2 + $0x120] sm:$0xff]  ;;  %v1942_v55 = vld [vmem:[#allocation2 + $0x130] sm:$0xff]  ;;  %v1945_v56 = vld [vmem:[#allocation2 + $0x148] sm:$0xff] }
  0x2b   :  { %v1944_v60 = vld [vmem:[#allocation2 + $0x140] sm:$0xff]  ;;  %v1946_v61 = vld [vmem:[#allocation2 + $0x150] sm:$0xff]  ;;  %v1949_v62 = vld [vmem:[#allocation2 + $0x168] sm:$0xff] }
  0x2c   :  { %3745 = vmatpush1.bf16.msk.msra.mxu1 %vm4434_vm2, %v3743_v14  ;;  %v1948_v3 = vld [vmem:[#allocation2 + $0x160] sm:$0xff]  ;;  %v1950_v4 = vld [vmem:[#allocation2 + $0x170] sm:$0xff]  ;;  %v1961_v8 = vld [vmem:[#allocation2 + $0x1c8] sm:$0xff] }
  0x2d   :  { %3255 = vmatmul.mubr.msk.f32.gmra.mrb[8].mxu0 %vm112_vm3, %v4514_v33  ;;  %v3800_v5 = vpack.c.bf16 %v1950_v4, %v1948_v3  ;;  %v3356_v6 = vld [vmem:[%s5654_s0 + $0xd0] sm:$0xff]  ;;  %v1963_v10 = vld [vmem:[#allocation2 + $0x1d8] sm:$0xff]  ;;  %v1960_v12 = vld [vmem:[#allocation2 + $0x1c0] sm:$0xff] }
  0x2e   :  { %573 = vmatprep.mubr.f32.mxu0 %v5665_v0  ;;  %v3810_v11 = vpack.c.bf16 %v1963_v10, %v1961_v8  ;;  %v1962_v13 = vld [vmem:[#allocation2 + $0x1d0] sm:$0xff]  ;;  %v1965_v17 = vld [vmem:[#allocation2 + $0x1e8] sm:$0xff]  ;;  %v1967_v18 = vld [vmem:[#allocation2 + $0x1f8] sm:$0xff]  ;;  %v1797_v8 = vlaneseq }
  0x2f   :  { %3225 = vmatmul.mubr.msk.f32.vlgmr.msra.gmra.mrb[0].mxu1 %vm112_vm3, %v4480_v26  ;;  %v1939_v26 = vld [vmem:[#allocation2 + $0x118] sm:$0xff]  ;;  %v3814_v19 = vpack.c.bf16 %v1967_v18, %v1965_v17  ;;  %v1964_v20 = vld [vmem:[#allocation2 + $0x1e0] sm:$0xff] }
  0x30   :  { %262 = vmatprep.mubr.f32.mxu1 %v5665_v0  ;;  %v3786_v28 = vpack.c.bf16 %v1939_v26, %v1937_v9  ;;  %v5145_v10 = vshrl.u32 %v1797_v8, 7 }
  0x31   :  { %3256 = vmatmul.mubr.msk.f32.gmra.mrb[10].mxu0 %vm112_vm3, %v4522_v34 }
  0x32   :  { %579 = vmatprep.mubr.f32.mxu0 %v5665_v0  ;;  %3787 = vmatprep.subr.bf16.mxu1 %v3786_v28  ;;  %5674 = vst [vmem:[#allocation6_spill] sm:$0xff] %v5145_v10 }
  0x33   :  { %3226 = vmatmul.mubr.msk.f32.gmra.mrb[2].mxu1 %vm112_vm3, %v4496_v31 }
  0x34   :  { %268 = vmatprep.mubr.f32.mxu1 %v5665_v0 }
  0x35   :  { %3257 = vmatmul.mubr.msk.f32.gmra.mrb[12].mxu0 %vm112_vm3, %v4530_v35 }
  0x36   :  { %585 = vmatprep.mubr.f32.mxu0 %v5665_v0 }
  0x37   :  { %3227 = vmatmul.mubr.msk.f32.gmra.mrb[4].mxu1 %vm112_vm3, %v4506_v32 }
  0x38   :  { %274 = vmatprep.mubr.f32.mxu1 %v5665_v0 }
  0x39   :  { %3258 = vmatmul.mubr.msk.f32.gmra.mrb[14].mxu0 %vm112_vm3, %v4538_v36 }
  0x3a   :  { %591 = vmatprep.mubr.f32.mxu0 %v5665_v0 }
  0x3b   :  { %3228 = vmatmul.mubr.msk.f32.gmra.mrb[6].mxu1 %vm112_vm3, %v4514_v33 }
  0x3c   :  { %280 = vmatprep.mubr.f32.mxu1 %v5665_v0 }
  0x3d   :  { %3259 = vmatmul.mubr.msk.f32.gmra.mrb[16].mxu0 %vm112_vm3, %v4546_v37 }
  0x3e   :  { %597 = vmatprep.mubr.f32.mxu0 %v5665_v0 }
  0x3f   :  { %3229 = vmatmul.mubr.msk.f32.gmra.mrb[8].mxu1 %vm112_vm3, %v4522_v34 }
  0x40   :  { %286 = vmatprep.mubr.f32.mxu1 %v5665_v0 }
  0x41   :  { %3260 = vmatmul.mubr.msk.f32.gmra.mrb[18].mxu0 %vm112_vm3, %v4554_v38 }
  0x42   :  { %603 = vmatprep.mubr.f32.mxu0 %v5665_v0 }
  0x43   :  { %3230 = vmatmul.mubr.msk.f32.gmra.mrb[10].mxu1 %vm112_vm3, %v4530_v35 }
  0x44   :  { %292 = vmatprep.mubr.f32.mxu1 %v5665_v0 }
  0x45   :  { %3261 = vmatmul.mubr.msk.f32.gmra.mrb[20].mxu0 %vm112_vm3, %v4562_v39 }
  0x46   :  { %609 = vmatprep.mubr.f32.mxu0 %v5665_v0 }
  0x47   :  { %3231 = vmatmul.mubr.msk.f32.gmra.mrb[12].mxu1 %vm112_vm3, %v4538_v36 }
  0x48   :  { %298 = vmatprep.mubr.f32.mxu1 %v5665_v0 }
  0x49   :  { %3262 = vmatmul.mubr.msk.f32.gmra.mrb[22].mxu0 %vm112_vm3, %v4570_v40 }
  0x4a   :  { %615 = vmatprep.mubr.f32.mxu0 %v5665_v0 }
  0x4b   :  { %3232 = vmatmul.mubr.msk.f32.gmra.mrb[14].mxu1 %vm112_vm3, %v4546_v37 }
  0x4c   :  { %304 = vmatprep.mubr.f32.mxu1 %v5665_v0 }
  0x4d   :  { %3263 = vmatmul.mubr.msk.f32.gmra.mrb[24].mxu0 %vm112_vm3, %v4578_v41 }
  0x4e   :  { %621 = vmatprep.mubr.f32.mxu0 %v5665_v0 }
  0x4f   :  { %3233 = vmatmul.mubr.msk.f32.gmra.mrb[16].mxu1 %vm112_vm3, %v4554_v38 }
  0x50   :  { %310 = vmatprep.mubr.f32.mxu1 %v5665_v0 }
  0x51   :  { %3264 = vmatmul.mubr.msk.f32.gmra.mrb[26].mxu0 %vm112_vm3, %v4586_v42 }
  0x52   :  { %627 = vmatprep.mubr.f32.mxu0 %v5665_v0 }
  0x53   :  { %3234 = vmatmul.mubr.msk.f32.gmra.mrb[18].mxu1 %vm112_vm3, %v4562_v39 }
  0x54   :  { %316 = vmatprep.mubr.f32.mxu1 %v5665_v0 }
  0x55   :  { %3265 = vmatmul.mubr.msk.f32.gmra.mrb[28].mxu0 %vm112_vm3, %v4594_v43 }
  0x56   :  { %633 = vmatprep.mubr.f32.mxu0 %v5665_v0 }
  0x57   :  { %3235 = vmatmul.mubr.msk.f32.gmra.mrb[20].mxu1 %vm112_vm3, %v4570_v40 }
  0x58   :  { %322 = vmatprep.mubr.f32.mxu1 %v5665_v0 }
  0x59   :  { %3266 = vmatmul.mubr.msk.f32.gmra.mrb[30].mxu0 %vm112_vm3, %v4602_v44 }
  0x5a   :  { %639 = vmatprep.mubr.f32.mxu0 %v5665_v0 }
  0x5b   :  { %3236 = vmatmul.mubr.msk.f32.gmra.mrb[22].mxu1 %vm112_vm3, %v4578_v41 }
  0x5c   :  { %328 = vmatprep.mubr.f32.mxu1 %v5665_v0 }
  0x5d   :  { %3267 = vmatmul.mubr.msk.f32.gmra.mrb[32].mxu0 %vm112_vm3, %v4610_v45 }
  0x5e   :  { %645 = vmatprep.mubr.f32.mxu0 %v5665_v0 }
  0x5f   :  { %3237 = vmatmul.mubr.msk.f32.gmra.mrb[24].mxu1 %vm112_vm3, %v4586_v42 }
  0x60   :  { %334 = vmatprep.mubr.f32.mxu1 %v5665_v0 }
  0x61   :  { %3268 = vmatmul.mubr.msk.f32.gmra.mrb[34].mxu0 %vm112_vm3, %v4618_v46 }
  0x62   :  { %651 = vmatprep.mubr.f32.mxu0 %v5665_v0 }
  0x63   :  { %3238 = vmatmul.mubr.msk.f32.gmra.mrb[26].mxu1 %vm112_vm3, %v4594_v43 }
  0x64   :  { %340 = vmatprep.mubr.f32.mxu1 %v5665_v0 }
  0x65   :  { %3269 = vmatmul.mubr.msk.f32.gmra.mrb[36].mxu0 %vm112_vm3, %v4626_v47 }
  0x66   :  { %657 = vmatprep.mubr.f32.mxu0 %v5665_v0 }
  0x67   :  { %3239 = vmatmul.mubr.msk.f32.gmra.mrb[28].mxu1 %vm112_vm3, %v4602_v44 }
  0x68   :  { %346 = vmatprep.mubr.f32.mxu1 %v5665_v0 }
  0x69   :  { %3270 = vmatmul.mubr.msk.f32.gmra.mrb[38].mxu0 %vm112_vm3, %v4634_v48 }
  0x6a   :  { %663 = vmatprep.mubr.f32.mxu0 %v5665_v0 }
  0x6b   :  { %3240 = vmatmul.mubr.msk.f32.gmra.mrb[30].mxu1 %vm112_vm3, %v4610_v45 }
  0x6c   :  { %352 = vmatprep.mubr.f32.mxu1 %v5665_v0 }
  0x6d   :  { %3271 = vmatmul.mubr.msk.f32.gmra.mrb[40].mxu0 %vm112_vm3, %v4642_v49 }
  0x6e   :  { %669 = vmatprep.mubr.f32.mxu0 %v5665_v0 }
  0x6f   :  { %3241 = vmatmul.mubr.msk.f32.gmra.mrb[32].mxu1 %vm112_vm3, %v4618_v46 }
  0x70   :  { %358 = vmatprep.mubr.f32.mxu1 %v5665_v0 }
  0x71   :  { %3272 = vmatmul.mubr.msk.f32.gmra.mrb[42].mxu0 %vm112_vm3, %v4650_v50 }
  0x72   :  { %675 = vmatprep.mubr.f32.mxu0 %v5665_v0 }
  0x73   :  { %3242 = vmatmul.mubr.msk.f32.gmra.mrb[34].mxu1 %vm112_vm3, %v4626_v47 }
  0x74   :  { %364 = vmatprep.mubr.f32.mxu1 %v5665_v0 }
  0x75   :  { %3273 = vmatmul.mubr.msk.f32.gmra.mrb[44].mxu0 %vm112_vm3, %v4658_v51 }
  0x76   :  { %681 = vmatprep.mubr.f32.mxu0 %v5665_v0 }
  0x77   :  { %3243 = vmatmul.mubr.msk.f32.gmra.mrb[36].mxu1 %vm112_vm3, %v4634_v48 }
  0x78   :  { %370 = vmatprep.mubr.f32.mxu1 %v5665_v0 }
  0x79   :  { %3274 = vmatmul.mubr.msk.f32.gmra.mrb[46].mxu0 %vm112_vm3, %v4666_v52 }
  0x7a   :  { %864 = vmatprep.mubr.f32.mxu0 %v5665_v0 }
  0x7b   :  { %3244 = vmatmul.mubr.msk.f32.gmra.mrb[38].mxu1 %vm112_vm3, %v4642_v49 }
  0x7c   :  { %376 = vmatprep.mubr.f32.mxu1 %v5665_v0 }
  0x7d   :  { %3309 = vmatmul.mubr.msk.f32.vlgmr.msra.gmra.mrb[0].mxu0 %vm112_vm3, %v4496_v31  ;;  %v1943_v31 = vld [vmem:[#allocation2 + $0x138] sm:$0xff] }
  0x7e   :  { %3769 = vmatpush1.bf16.msra.mxu0 %v3768_v57  ;;  %870 = vmatprep.mubr.f32.mxu0 %v5665_v0  ;;  %v3790_v53 = vpack.c.bf16 %v1943_v31, %v1941_v30  ;;  %v1947_v57 = vld [vmem:[#allocation2 + $0x158] sm:$0xff] }
  0x7f   :  { %3772 = vmatprep.subr.msk.bf16.mxu0 %vm4434_vm2, %v3770_v58  ;;  %3245 = vmatmul.mubr.msk.f32.gmra.mrb[40].mxu1 %vm112_vm3, %v4650_v50  ;;  %v3792_v58 = vpack.c.bf16 %v1942_v55, %v1940_v54  ;;  %v3794_v59 = vpack.c.bf16 %v1947_v57, %v1945_v56 }
  0x80   :  { %382 = vmatprep.mubr.f32.mxu1 %v5665_v0 }
  0x81   :  { %3310 = vmatmul.mubr.msk.f32.gmra.mrb[2].mxu0 %vm112_vm3, %v4506_v32 }
  0x82   :  { %876 = vmatprep.mubr.f32.mxu0 %v5665_v0  ;;  %3775 = vmatpush1.bf16.msk.msra.mxu0 %vm4434_vm2, %v3773_v63  ;;  %v1951_v63 = vld [vmem:[#allocation2 + $0x178] sm:$0xff] }
  0x83   :  { %3777 = vmatprep.subr.bf16.mxu0 %v3776_v1  ;;  %3246 = vmatmul.mubr.msk.f32.gmra.mrb[42].mxu1 %vm112_vm3, %v4658_v51  ;;  %v3796_v1 = vpack.c.bf16 %v1946_v61, %v1944_v60  ;;  %v3798_v2 = vpack.c.bf16 %v1951_v63, %v1949_v62 }
  0x84   :  { %388 = vmatprep.mubr.f32.mxu1 %v5665_v0 }
  0x85   :  { %3311 = vmatmul.mubr.msk.f32.gmra.mrb[4].mxu0 %vm112_vm3, %v4514_v33 }
  0x86   :  { %882 = vmatprep.mubr.f32.mxu0 %v5665_v0 }
  0x87   :  { %3247 = vmatmul.mubr.msk.f32.gmra.mrb[44].mxu1 %vm112_vm3, %v4666_v52 }
  0x88   :  { %394 = vmatprep.mubr.f32.mxu1 %v5665_v0 }
  0x89   :  { %3312 = vmatmul.mubr.msk.f32.gmra.mrb[6].mxu0 %vm112_vm3, %v4522_v34 }
  0x8a   :  { %888 = vmatprep.mubr.f32.mxu0 %v5665_v0 }
  0x8b   :  { %3248 = vmatmul.mubr.msk.f32.gmra.mrb[46].mxu1 %vm112_vm3, %v4814_v15 }
  0x8c   :  { %2032 = vmatprep.mubr.f32.mxu1 %v5665_v0 }
  0x8d   :  { %3313 = vmatmul.mubr.msk.f32.gmra.mrb[8].mxu0 %vm112_vm3, %v4530_v35 }
  0x8e   :  { %894 = vmatprep.mubr.f32.mxu0 %v5665_v0 }
  0x91   :  { %3314 = vmatmul.mubr.msk.f32.gmra.mrb[10].mxu0 %vm112_vm3, %v4538_v36 }
  0x92   :  { %900 = vmatprep.mubr.f32.mxu0 %v5665_v0 }
  0x95   :  { %3315 = vmatmul.mubr.msk.f32.gmra.mrb[12].mxu0 %vm112_vm3, %v4546_v37 }
  0x96   :  { %906 = vmatprep.mubr.f32.mxu0 %v5665_v0 }
  0x99   :  { %3316 = vmatmul.mubr.msk.f32.gmra.mrb[14].mxu0 %vm112_vm3, %v4554_v38 }
  0x9a   :  { %912 = vmatprep.mubr.f32.mxu0 %v5665_v0 }
  0x9d   :  { %3317 = vmatmul.mubr.msk.f32.gmra.mrb[16].mxu0 %vm112_vm3, %v4562_v39 }
  0x9e   :  { %918 = vmatprep.mubr.f32.mxu0 %v5665_v0 }
  0xa1   :  { %3318 = vmatmul.mubr.msk.f32.gmra.mrb[18].mxu0 %vm112_vm3, %v4570_v40 }
  0xa2   :  { %924 = vmatprep.mubr.f32.mxu0 %v5665_v0 }
  0xa5   :  { %3319 = vmatmul.mubr.msk.f32.gmra.mrb[20].mxu0 %vm112_vm3, %v4578_v41 }
  0xa6   :  { %930 = vmatprep.mubr.f32.mxu0 %v5665_v0 }
  0xa9   :  { %3320 = vmatmul.mubr.msk.f32.gmra.mrb[22].mxu0 %vm112_vm3, %v4586_v42 }
  0xaa   :  { %936 = vmatprep.mubr.f32.mxu0 %v5665_v0 }
  0xad   :  { %3321 = vmatmul.mubr.msk.f32.gmra.mrb[24].mxu0 %vm112_vm3, %v4594_v43 }
  0xae   :  { %942 = vmatprep.mubr.f32.mxu0 %v5665_v0 }
  0xb1   :  { %3322 = vmatmul.mubr.msk.f32.gmra.mrb[26].mxu0 %vm112_vm3, %v4602_v44 }
  0xb2   :  { %948 = vmatprep.mubr.f32.mxu0 %v5665_v0 }
  0xb5   :  { %3323 = vmatmul.mubr.msk.f32.gmra.mrb[28].mxu0 %vm112_vm3, %v4610_v45 }
  0xb6   :  { %954 = vmatprep.mubr.f32.mxu0 %v5665_v0 }
  0xb9   :  { %3324 = vmatmul.mubr.msk.f32.gmra.mrb[30].mxu0 %vm112_vm3, %v4618_v46 }
  0xba   :  { %960 = vmatprep.mubr.f32.mxu0 %v5665_v0 }
  0xbd   :  { %3325 = vmatmul.mubr.msk.f32.gmra.mrb[32].mxu0 %vm112_vm3, %v4626_v47 }
  0xbe   :  { %966 = vmatprep.mubr.f32.mxu0 %v5665_v0 }
  0xc1   :  { %3326 = vmatmul.mubr.msk.f32.gmra.mrb[34].mxu0 %vm112_vm3, %v4634_v48 }
  0xc2   :  { %972 = vmatprep.mubr.f32.mxu0 %v5665_v0 }
  0xc5   :  { %3327 = vmatmul.mubr.msk.f32.gmra.mrb[36].mxu0 %vm112_vm3, %v4642_v49 }
  0xc6   :  { %978 = vmatprep.mubr.f32.mxu0 %v5665_v0 }
  0xc9   :  { %3328 = vmatmul.mubr.msk.f32.gmra.mrb[38].mxu0 %vm112_vm3, %v4650_v50 }
  0xca   :  { %984 = vmatprep.mubr.f32.mxu0 %v5665_v0 }
  0xcd   :  { %3329 = vmatmul.mubr.msk.f32.gmra.mrb[40].mxu0 %vm112_vm3, %v4658_v51 }
  0xce   :  { %990 = vmatprep.mubr.f32.mxu0 %v5665_v0 }
  0xd1   :  { %3330 = vmatmul.mubr.msk.f32.gmra.mrb[42].mxu0 %vm112_vm3, %v4666_v52 }
  0xd2   :  { %996 = vmatprep.mubr.f32.mxu0 %v5665_v0 }
  0xd5   :  { %3331 = vmatmul.mubr.msk.f32.gmra.mrb[44].mxu0 %vm112_vm3, %v4814_v15 }
  0xd6   :  { %1002 = vmatprep.mubr.f32.mxu0 %v5665_v0 }
  0xd9   :  { %3332 = vmatmul.mubr.msk.f32.gmra.mrb[46].mxu0 %vm112_vm3, %v4825_v16 }
  0xda   :  { %1233 = vmatprep.mubr.f32.mxu0 %v5665_v0 }
  0xdd   :  { %3367 = vmatmul.mubr.msk.f32.vlgmr.msra.gmra.mrb[0].mxu0 %vm112_vm3, %v4506_v32  ;;  %v3788_v32 = vpack.c.bf16 %v1938_v29, %v1936_v27 }
  0xde   :  { %3779 = vmatpush1.bf16.msra.mxu0 %v3778_v21  ;;  %1239 = vmatprep.mubr.f32.mxu0 %v5665_v0  ;;  %v1966_v21 = vld [vmem:[#allocation2 + $0x1f0] sm:$0xff] }
  0xdf   :  { %3782 = vmatprep.subr.msk.bf16.mxu0 %vm4434_vm2, %v3780_v22  ;;  %3789 = vmatpush1.bf16.msra.mxu1 %v3788_v32  ;;  %v3816_v23 = vpack.c.bf16 %v1966_v21, %v1964_v20 }
  0xe0   :  { %3791 = vmatprep.subr.bf16.mxu1 %v3790_v53 }
  0xe1   :  { %3368 = vmatmul.mubr.msk.f32.gmra.mrb[2].mxu0 %vm112_vm3, %v4514_v33 }
  0xe2   :  { %1245 = vmatprep.mubr.f32.mxu0 %v5665_v0  ;;  %3785 = vmatpush1.bf16.msk.msra.mxu0 %vm4434_vm2, %v3783_v25 }
  0xe3   :  { %3793 = vmatpush1.bf16.msra.mxu1 %v3792_v58  ;;  %v1904_v58 = vld [vmem:[#allocation2 + $0x8] sm:$0xff] }
  0xe4   :  { %3795 = vmatprep.subr.bf16.mxu1 %v3794_v59  ;;  %v1906_v59 = vld [vmem:[#allocation2 + $0x18] sm:$0xff] }
  0xe5   :  { %3369 = vmatmul.mubr.msk.f32.gmra.mrb[4].mxu0 %vm112_vm3, %v4522_v34  ;;  %v3818_v60 = vpack.c.bf16 %v1906_v59, %v1904_v58 }
  0xe6   :  { %1251 = vmatprep.mubr.f32.mxu0 %v5665_v0 }
  0xe7   :  { %3797 = vmatpush1.bf16.msra.mxu1 %v3796_v1 }
  0xe8   :  { %3799 = vmatprep.subr.bf16.mxu1 %v3798_v2 }
  0xe9   :  { %3370 = vmatmul.mubr.msk.f32.gmra.mrb[6].mxu0 %vm112_vm3, %v4530_v35 }
  0xea   :  { %1257 = vmatprep.mubr.f32.mxu0 %v5665_v0 }
  0xeb   :  { %3801 = vmatpush1.bf16.msra.mxu1 %v3800_v5 }
  0xed   :  { %3371 = vmatmul.mubr.msk.f32.gmra.mrb[8].mxu0 %vm112_vm3, %v4538_v36 }
  0xee   :  { %1263 = vmatprep.mubr.f32.mxu0 %v5665_v0 }
  0xf1   :  { %3372 = vmatmul.mubr.msk.f32.gmra.mrb[10].mxu0 %vm112_vm3, %v4546_v37 }
  0xf2   :  { %1269 = vmatprep.mubr.f32.mxu0 %v5665_v0 }
  0xf5   :  { %3373 = vmatmul.mubr.msk.f32.gmra.mrb[12].mxu0 %vm112_vm3, %v4554_v38 }
  0xf6   :  { %1275 = vmatprep.mubr.f32.mxu0 %v5665_v0 }
  0xf9   :  { %3374 = vmatmul.mubr.msk.f32.gmra.mrb[14].mxu0 %vm112_vm3, %v4562_v39 }
  0xfa   :  { %1281 = vmatprep.mubr.f32.mxu0 %v5665_v0 }
  0xfd   :  { %3375 = vmatmul.mubr.msk.f32.gmra.mrb[16].mxu0 %vm112_vm3, %v4570_v40 }
  0xfe   :  { %1287 = vmatprep.mubr.f32.mxu0 %v5665_v0 }
 0x101   :  { %3376 = vmatmul.mubr.msk.f32.gmra.mrb[18].mxu0 %vm112_vm3, %v4578_v41 }
 0x102   :  { %1293 = vmatprep.mubr.f32.mxu0 %v5665_v0 }
 0x105   :  { %3377 = vmatmul.mubr.msk.f32.gmra.mrb[20].mxu0 %vm112_vm3, %v4586_v42 }
 0x106   :  { %1299 = vmatprep.mubr.f32.mxu0 %v5665_v0 }
 0x109   :  { %3378 = vmatmul.mubr.msk.f32.gmra.mrb[22].mxu0 %vm112_vm3, %v4594_v43 }
 0x10a   :  { %1305 = vmatprep.mubr.f32.mxu0 %v5665_v0 }
 0x10d   :  { %3379 = vmatmul.mubr.msk.f32.gmra.mrb[24].mxu0 %vm112_vm3, %v4602_v44 }
 0x10e   :  { %1311 = vmatprep.mubr.f32.mxu0 %v5665_v0 }
 0x111   :  { %3380 = vmatmul.mubr.msk.f32.gmra.mrb[26].mxu0 %vm112_vm3, %v4610_v45 }
 0x112   :  { %1317 = vmatprep.mubr.f32.mxu0 %v5665_v0 }
 0x115   :  { %3381 = vmatmul.mubr.msk.f32.gmra.mrb[28].mxu0 %vm112_vm3, %v4618_v46 }
 0x116   :  { %1323 = vmatprep.mubr.f32.mxu0 %v5665_v0 }
 0x119   :  { %3382 = vmatmul.mubr.msk.f32.gmra.mrb[30].mxu0 %vm112_vm3, %v4626_v47 }
 0x11a   :  { %1329 = vmatprep.mubr.f32.mxu0 %v5665_v0 }
 0x11d   :  { %3383 = vmatmul.mubr.msk.f32.gmra.mrb[32].mxu0 %vm112_vm3, %v4634_v48 }
 0x11e   :  { %1335 = vmatprep.mubr.f32.mxu0 %v5665_v0 }
 0x121   :  { %3384 = vmatmul.mubr.msk.f32.gmra.mrb[34].mxu0 %vm112_vm3, %v4642_v49 }
 0x122   :  { %1341 = vmatprep.mubr.f32.mxu0 %v5665_v0 }
 0x125   :  { %3385 = vmatmul.mubr.msk.f32.gmra.mrb[36].mxu0 %vm112_vm3, %v4650_v50 }
 0x126   :  { %1347 = vmatprep.mubr.f32.mxu0 %v5665_v0 }
 0x129   :  { %3386 = vmatmul.mubr.msk.f32.gmra.mrb[38].mxu0 %vm112_vm3, %v4658_v51 }
 0x12a   :  { %1353 = vmatprep.mubr.f32.mxu0 %v5665_v0 }
 0x12d   :  { %3387 = vmatmul.mubr.msk.f32.gmra.mrb[40].mxu0 %vm112_vm3, %v4666_v52 }
 0x12e   :  { %1359 = vmatprep.mubr.f32.mxu0 %v5665_v0 }
 0x131   :  { %3388 = vmatmul.mubr.msk.f32.gmra.mrb[42].mxu0 %vm112_vm3, %v4814_v15 }
 0x132   :  { %1365 = vmatprep.mubr.f32.mxu0 %v5665_v0 }
 0x135   :  { %3389 = vmatmul.mubr.msk.f32.gmra.mrb[44].mxu0 %vm112_vm3, %v4825_v16 }
 0x136   :  { %1371 = vmatprep.mubr.f32.mxu0 %v5665_v0 }
 0x139   :  { %3390 = vmatmul.mubr.msk.f32.gmra.mrb[46].mxu0 %vm112_vm3, %v3356_v6 }
 0x13a   :  { %1602 = vmatprep.mubr.f32.mxu0 %v5665_v0 }
 0x13d   :  { %3425 = vmatmul.mubr.msk.f32.vlgmr.msra.gmra.mrb[0].mxu0 %vm112_vm3, %v4514_v33  ;;  %v5040_v33 = vpop.f32.mrb[0].mxu1 }
 0x13e   :  { %1608 = vmatprep.mubr.f32.mxu0 %v5665_v0 }
 0x141   :  { %3426 = vmatmul.mubr.msk.f32.gmra.mrb[2].mxu0 %vm112_vm3, %v4522_v34  ;;  %v5042_v34 = vpop.f32.mrb[1].mxu1 }
 0x142   :  { %1614 = vmatprep.mubr.f32.mxu0 %v5665_v0 }
 0x145   :  { %3427 = vmatmul.mubr.msk.f32.gmra.mrb[4].mxu0 %vm112_vm3, %v4530_v35  ;;  %v5047_v35 = vpop.f32.mrb[2].mxu1 }
 0x146   :  { %1620 = vmatprep.mubr.f32.mxu0 %v5665_v0 }
 0x149   :  { %3428 = vmatmul.mubr.msk.f32.gmra.mrb[6].mxu0 %vm112_vm3, %v4538_v36  ;;  %v5049_v36 = vpop.f32.mrb[3].mxu1 }
 0x14a   :  { %1626 = vmatprep.mubr.f32.mxu0 %v5665_v0 }
 0x14d   :  { %3429 = vmatmul.mubr.msk.f32.gmra.mrb[8].mxu0 %vm112_vm3, %v4546_v37  ;;  %v1953_v37 = vld [vmem:[#allocation2 + $0x188] sm:$0xff] }
 0x14e   :  { %1632 = vmatprep.mubr.f32.mxu0 %v5665_v0 }
 0x151   :  { %3430 = vmatmul.mubr.msk.f32.gmra.mrb[10].mxu0 %vm112_vm3, %v4554_v38  ;;  %v1955_v38 = vld [vmem:[#allocation2 + $0x198] sm:$0xff] }
 0x152   :  { %1638 = vmatprep.mubr.f32.mxu0 %v5665_v0 }
 0x155   :  { %3431 = vmatmul.mubr.msk.f32.gmra.mrb[12].mxu0 %vm112_vm3, %v4562_v39  ;;  %v3414_v39 = vld [vmem:[%s5654_s0 + $0xd8] sm:$0xff] }
 0x156   :  { %1644 = vmatprep.mubr.f32.mxu0 %v5665_v0 }
 0x159   :  { %3432 = vmatmul.mubr.msk.f32.gmra.mrb[14].mxu0 %vm112_vm3, %v4570_v40  ;;  %v3802_v40 = vpack.c.bf16 %v1955_v38, %v1953_v37 }
 0x15a   :  { %1650 = vmatprep.mubr.f32.mxu0 %v5665_v0 }
 0x15b   :  { %3803 = vmatprep.subr.bf16.mxu1 %v3802_v40 }
 0x15d   :  { %3433 = vmatmul.mubr.msk.f32.gmra.mrb[16].mxu0 %vm112_vm3, %v4578_v41  ;;  %v1952_v41 = vld [vmem:[#allocation2 + $0x180] sm:$0xff] }
 0x15e   :  { %1656 = vmatprep.mubr.f32.mxu0 %v5665_v0 }
 0x161   :  { %3434 = vmatmul.mubr.msk.f32.gmra.mrb[18].mxu0 %vm112_vm3, %v4586_v42  ;;  %v1954_v42 = vld [vmem:[#allocation2 + $0x190] sm:$0xff] }
 0x162   :  { %1662 = vmatprep.mubr.f32.mxu0 %v5665_v0 }
 0x165   :  { %3435 = vmatmul.mubr.msk.f32.gmra.mrb[20].mxu0 %vm112_vm3, %v4594_v43  ;;  %v3804_v43 = vpack.c.bf16 %v1954_v42, %v1952_v41 }
 0x166   :  { %1668 = vmatprep.mubr.f32.mxu0 %v5665_v0 }
 0x167   :  { %3805 = vmatpush1.bf16.msra.mxu1 %v3804_v43 }
 0x169   :  { %3436 = vmatmul.mubr.msk.f32.gmra.mrb[22].mxu0 %vm112_vm3, %v4602_v44  ;;  %v5056_v44 = vpop.f32.mrb[4].mxu1 }
 0x16a   :  { %1674 = vmatprep.mubr.f32.mxu0 %v5665_v0 }
 0x16d   :  { %3437 = vmatmul.mubr.msk.f32.gmra.mrb[24].mxu0 %vm112_vm3, %v4610_v45  ;;  %v5058_v45 = vpop.f32.mrb[5].mxu1 }
 0x16e   :  { %1680 = vmatprep.mubr.f32.mxu0 %v5665_v0 }
 0x171   :  { %3438 = vmatmul.mubr.msk.f32.gmra.mrb[26].mxu0 %vm112_vm3, %v4618_v46  ;;  %v1957_v46 = vld [vmem:[#allocation2 + $0x1a8] sm:$0xff] }
 0x172   :  { %1686 = vmatprep.mubr.f32.mxu0 %v5665_v0 }
 0x175   :  { %3439 = vmatmul.mubr.msk.f32.gmra.mrb[28].mxu0 %vm112_vm3, %v4626_v47  ;;  %v1959_v47 = vld [vmem:[#allocation2 + $0x1b8] sm:$0xff] }
 0x176   :  { %1692 = vmatprep.mubr.f32.mxu0 %v5665_v0 }
 0x179   :  { %3440 = vmatmul.mubr.msk.f32.gmra.mrb[30].mxu0 %vm112_vm3, %v4634_v48  ;;  %v3806_v48 = vpack.c.bf16 %v1959_v47, %v1957_v46 }
 0x17a   :  { %1698 = vmatprep.mubr.f32.mxu0 %v5665_v0 }
 0x17b   :  { %3807 = vmatprep.subr.bf16.mxu1 %v3806_v48 }
 0x17d   :  { %3441 = vmatmul.mubr.msk.f32.gmra.mrb[32].mxu0 %vm112_vm3, %v4642_v49  ;;  %v1956_v49 = vld [vmem:[#allocation2 + $0x1a0] sm:$0xff] }
 0x17e   :  { %1704 = vmatprep.mubr.f32.mxu0 %v5665_v0 }
 0x181   :  { %3442 = vmatmul.mubr.msk.f32.gmra.mrb[34].mxu0 %vm112_vm3, %v4650_v50  ;;  %v1958_v50 = vld [vmem:[#allocation2 + $0x1b0] sm:$0xff] }
 0x182   :  { %1710 = vmatprep.mubr.f32.mxu0 %v5665_v0 }
 0x185   :  { %3443 = vmatmul.mubr.msk.f32.gmra.mrb[36].mxu0 %vm112_vm3, %v4658_v51  ;;  %v5061_v51 = vpop.f32.mrb[6].mxu1 }
 0x186   :  { %1716 = vmatprep.mubr.f32.mxu0 %v5665_v0  ;;  %v5063_v7 = vpop.f32.mrb[7].mxu1 }
 0x187   :  { %v5065_v14 = vpop.f32.mrb[8].mxu1 }
 0x189   :  { %3444 = vmatmul.mubr.msk.f32.gmra.mrb[38].mxu0 %vm112_vm3, %v4666_v52  ;;  %v3808_v52 = vpack.c.bf16 %v1958_v50, %v1956_v49 }
 0x18a   :  { %1722 = vmatprep.mubr.f32.mxu0 %v5665_v0 }
 0x18b   :  { %3809 = vmatpush1.bf16.msra.mxu1 %v3808_v52 }
 0x18c   :  { %3811 = vmatprep.subr.bf16.mxu1 %v3810_v11  ;;  %v5664_v11 = vsub.s32 0, %v5145_v10 }
 0x18d   :  { %3445 = vmatmul.mubr.msk.f32.gmra.mrb[40].mxu0 %vm112_vm3, %v4814_v15  ;;  %v3812_v15 = vpack.c.bf16 %v1962_v13, %v1960_v12  ;;  %v1795_v12 = vld [vmem:[%s5656_s2] sm:$0x3]  ;;  %v5669_v13 = vsub.s32 1, %v5145_v10 }
 0x18e   :  { %1728 = vmatprep.mubr.f32.mxu0 %v5665_v0 }
 0x18f   :  { %3813 = vmatpush1.bf16.msra.mxu1 %v3812_v15  ;;  %v5154_v15 = vrot.slane %v1795_v12, %v5664_v11  ;;  %v5158_v18 = vrot.slane %v1795_v12, %v5669_v13 }
 0x190   :  { %3815 = vmatprep.subr.bf16.mxu1 %v3814_v19 }
 0x191   :  { %3446 = vmatmul.mubr.msk.f32.gmra.mrb[42].mxu0 %vm112_vm3, %v4825_v16  ;;  %v5067_v16 = vpop.f32.mrb[9].mxu1 }
 0x192   :  { %1734 = vmatprep.mubr.f32.mxu0 %v5665_v0  ;;  %v5069_v22 = vpop.f32.mrb[10].mxu1 }
 0x193   :  { %v5071_v24 = vpop.f32.mrb[11].mxu1  ;;  %3817 = vmatpush1.bf16.msra.mxu1 %v3816_v23 }
 0x194   :  { %v5073_v25 = vpop.f32.mrb[12].mxu1  ;;  %3819 = vmatprep.subr.bf16.mxu1 %v3818_v60 }
 0x195   :  { %3447 = vmatmul.mubr.msk.f32.gmra.mrb[44].mxu0 %vm112_vm3, %v3356_v6  ;;  %v5075_v9 = vpop.f32.mrb[13].mxu1 }
 0x196   :  { %1740 = vmatprep.mubr.f32.mxu0 %v5665_v0  ;;  %v5077_v26 = vpop.f32.mrb[14].mxu1 }
 0x197   :  { %v5079_v27 = vpop.f32.mrb[15].mxu1 }
 0x198   :  { %v5081_v28 = vpop.f32.mrb[16].mxu1 }
 0x199   :  { %3448 = vmatmul.mubr.msk.f32.gmra.mrb[46].mxu0 %vm112_vm3, %v3414_v39  ;;  %v5083_v29 = vpop.f32.mrb[17].mxu1 }
 0x19a   :  { %v5085_v30 = vpop.f32.mrb[18].mxu1 }
 0x19b   :  { %v5087_v31 = vpop.f32.mrb[19].mxu1 }
 0x19c   :  { %v5089_v32 = vpop.f32.mrb[20].mxu1 }
 0x19d   :  { %v5091_v53 = vpop.f32.mrb[21].mxu1 }
 0x19e   :  { %v5093_v54 = vpop.f32.mrb[22].mxu1 }
 0x19f   :  { %v5095_v55 = vpop.f32.mrb[23].mxu1 }
 0x1a0   :  { %v5097_v56 = vpop.f32.mrb[24].mxu1 }
 0x1a1   :  { %v5099_v57 = vpop.f32.mrb[25].mxu1 }
 0x1a2   :  { %v5101_v61 = vpop.f32.mrb[26].mxu1 }
 0x1a3   :  { %v5103_v62 = vpop.f32.mrb[27].mxu1 }
 0x1a4   :  { %v5105_v63 = vpop.f32.mrb[28].mxu1 }
 0x1a5   :  { %v5107_v1 = vpop.f32.mrb[29].mxu1 }
 0x1a6   :  { %v5109_v2 = vpop.f32.mrb[30].mxu1 }
 0x1a7   :  { %v5111_v3 = vpop.f32.mrb[31].mxu1 }
 0x1a8   :  { %v5113_v4 = vpop.f32.mrb[32].mxu1 }
 0x1a9   :  { %v5115_v5 = vpop.f32.mrb[33].mxu1 }
 0x1aa   :  { %v5117_v6 = vpop.f32.mrb[34].mxu1 }
 0x1ab   :  { %v5119_v37 = vpop.f32.mrb[35].mxu1 }
 0x1ac   :  { %v5121_v38 = vpop.f32.mrb[36].mxu1 }
 0x1ad   :  { %v5123_v39 = vpop.f32.mrb[37].mxu1 }
 0x1ae   :  { %v5125_v40 = vpop.f32.mrb[38].mxu1 }
 0x1af   :  { %v5127_v41 = vpop.f32.mrb[39].mxu1 }
 0x1b0   :  { %v5129_v42 = vpop.f32.mrb[40].mxu1 }
 0x1b1   :  { %v5131_v43 = vpop.f32.mrb[41].mxu1 }
 0x1b2   :  { %v5133_v46 = vpop.f32.mrb[42].mxu1 }
 0x1b3   :  { %v5135_v47 = vpop.f32.mrb[43].mxu1 }
 0x1b4   :  { %v5137_v48 = vpop.f32.mrb[44].mxu1 }
 0x1b5   :  { %v5139_v49 = vpop.f32.mrb[45].mxu1 }
 0x1b6   :  { %v5141_v50 = vpop.f32.mrb[46].mxu1 }
 0x1b7   :  { %v5143_v52 = vpop.f32.mrb[47].mxu1 }
 0x1b8   :  { %5673 = vst [vmem:[#allocation5_spill] sm:$0xff] %v5143_v52 }
 0x210   :  { %v1604_v17 = vpop.f32.mrb[0].mxu0 }
 0x211   :  { %v4054_v19 = vadd.f32 %v1604_v17, %v5040_v33  ;;  %v1606_v20 = vpop.f32.mrb[1].mxu0 }
 0x212   :  { %v4055_v21 = vadd.f32 %v1606_v20, %v5042_v34 }
 0x213   :  { %v1807_v23 = vadd.f32 %v4054_v19, %v5154_v15 }
 0x214   :  { %v1808_v58 = vadd.f32 %v4055_v21, %v5158_v18  ;;  %v1610_v59 = vpop.f32.mrb[2].mxu0 }
 0x215   :  { %v4056_v60 = vadd.f32 %v1610_v59, %v5047_v35  ;;  %v1612_v8 = vpop.f32.mrb[3].mxu0 }
 0x216   :  { %v1855_v11 = vmax.f32 %v1807_v23, %v1808_v58  ;;  %v4057_v0 = vadd.f32 %v1612_v8, %v5049_v36 }
 0x217   :  { %v1809_v10 = vadd.f32 %v4056_v60, %v5154_v15 }
 0x218   :  { %v1810_v12 = vadd.f32 %v4057_v0, %v5158_v18  ;;  %v1616_v13 = vpop.f32.mrb[4].mxu0 }
 0x219   :  { %v4058_v33 = vadd.f32 %v1616_v13, %v5056_v44  ;;  %v1618_v17 = vpop.f32.mrb[5].mxu0 }
 0x21a   :  { %v1856_v34 = vmax.f32 %v1809_v10, %v1810_v12  ;;  %v4059_v19 = vadd.f32 %v1618_v17, %v5058_v45  ;;  %v1903_v12 = vld [vmem:[#allocation2] sm:$0xff] }
 0x21b   :  { %v1811_v20 = vadd.f32 %v4058_v33, %v5154_v15  ;;  %v1905_v33 = vld [vmem:[#allocation2 + $0x10] sm:$0xff] }
 0x21c   :  { %v5171_v21 = vmax.f32 %v1855_v11, %v1856_v34  ;;  %v1812_v35 = vadd.f32 %v4059_v19, %v5158_v18  ;;  %v1622_v23 = vpop.f32.mrb[6].mxu0  ;;  %v1910_v34 = vld [vmem:[#allocation2 + $0x38] sm:$0xff] }
 0x21d   :  { %v4060_v36 = vadd.f32 %v1622_v23, %v5061_v51  ;;  %v1624_v58 = vpop.f32.mrb[7].mxu0  ;;  %v1908_v51 = vld [vmem:[#allocation2 + $0x28] sm:$0xff] }
 0x21e   :  { %v1857_v59 = vmax.f32 %v1811_v20, %v1812_v35  ;;  %v4061_v0 = vadd.f32 %v1624_v58, %v5063_v7 }
 0x21f   :  { %v1813_v60 = vadd.f32 %v4060_v36, %v5154_v15  ;;  %v3820_v36 = vpack.c.bf16 %v1905_v33, %v1903_v12  ;;  %v5675_v12 = vmov 0.0  }
 0x220   :  { %v1814_v44 = vadd.f32 %v4061_v0, %v5158_v18  ;;  %v1628_v10 = vpop.f32.mrb[8].mxu0  ;;  %v3822_v0 = vpack.c.bf16 %v1910_v34, %v1908_v51  ;;  %v1911_v34 = vld [vmem:[#allocation2 + $0x40] sm:$0xff] }
 0x221   :  { %v4062_v45 = vadd.f32 %v1628_v10, %v5065_v14  ;;  %v1630_v13 = vpop.f32.mrb[9].mxu0 }
 0x222   :  { %v1858_v8 = vmax.f32 %v1813_v60, %v1814_v44  ;;  %v4063_v11 = vadd.f32 %v1630_v13, %v5067_v16  ;;  %v1907_v60 = vld [vmem:[#allocation2 + $0x20] sm:$0xff]  ;;  %v1909_v44 = vld [vmem:[#allocation2 + $0x30] sm:$0xff] }
 0x223   :  { %v1815_v17 = vadd.f32 %v4062_v45, %v5154_v15  ;;  %v1912_v45 = vld [vmem:[#allocation2 + $0x48] sm:$0xff] }
 0x224   :  { %v5181_v19 = vmax.f32 %v1857_v59, %v1858_v8  ;;  %v1816_v7 = vadd.f32 %v4063_v11, %v5158_v18  ;;  %v1634_v20 = vpop.f32.mrb[10].mxu0  ;;  %v1914_v59 = vld [vmem:[#allocation2 + $0x58] sm:$0xff] }
 0x225   :  { %v4064_v35 = vadd.f32 %v1634_v20, %v5069_v22  ;;  %v1636_v23 = vpop.f32.mrb[11].mxu0  ;;  %v3826_v51 = vpack.c.bf16 %v1914_v59, %v1912_v45  ;;  %v1917_v45 = vld [vmem:[#allocation2 + $0x70] sm:$0xff] }
 0x226   :  { %v5670_v14 = vmax.f32 %v5181_v19, 0.0  ;;  %v1859_v58 = vmax.f32 %v1815_v17, %v1816_v7  ;;  %v4065_v16 = vadd.f32 %v1636_v23, %v5071_v24  ;;  %v3824_v24 = vpack.c.bf16 %v1909_v44, %v1907_v60  ;;  %v1913_v7 = vld [vmem:[#allocation2 + $0x50] sm:$0xff]  ;;  %v1918_v23 = vld [vmem:[#allocation2 + $0x78] sm:$0xff] }
 0x227   :  { %v1817_v10 = vadd.f32 %v4064_v35, %v5154_v15  ;;  %v1916_v35 = vld [vmem:[#allocation2 + $0x68] sm:$0xff] }
 0x228   :  { %v1818_v13 = vadd.f32 %v4065_v16, %v5158_v18  ;;  %v1640_v8 = vpop.f32.mrb[12].mxu0  ;;  %2033 = vmatmul.mubr.f32.vlgmr.msra.gmra.mrb[48].mxu1 %v5670_v14  ;;  %v3830_v44 = vpack.c.bf16 %v1918_v23, %v1916_v35 }
 0x229   :  { %v4066_v22 = vadd.f32 %v1640_v8, %v5073_v25  ;;  %v1642_v11 = vpop.f32.mrb[13].mxu0  ;;  %2038 = vmatprep.mubr.f32.mxu1 %v5675_v12  ;;  %3821 = vmatpush1.bf16.msra.mxu1 %v3820_v36  ;;  %v3828_v36 = vpack.c.bf16 %v1913_v7, %v1911_v34  ;;  %v1924_v7 = vld [vmem:[#allocation2 + $0xa8] sm:$0xff] }
 0x22a   :  { %v1860_v33 = vmax.f32 %v1817_v10, %v1818_v13  ;;  %v4067_v17 = vadd.f32 %v1642_v11, %v5075_v9  ;;  %3823 = vmatprep.subr.bf16.mxu1 %v3822_v0  ;;  %v1915_v10 = vld [vmem:[#allocation2 + $0x60] sm:$0xff]  ;;  %v1920_v13 = vld [vmem:[#allocation2 + $0x88] sm:$0xff] }
 0x22b   :  { %v1819_v20 = vadd.f32 %v4066_v22, %v5154_v15  ;;  %v1922_v22 = vld [vmem:[#allocation2 + $0x98] sm:$0xff] }
 0x22c   :  { %v1820_v16 = vadd.f32 %v4067_v17, %v5158_v18  ;;  %v1646_v14 = vpop.f32.mrb[14].mxu0  ;;  %v1881_v25 = vmax.f32 %v1859_v58, %v1860_v33  ;;  %v3834_v33 = vpack.c.bf16 %v1922_v22, %v1920_v13  ;;  %v1919_v17 = vld [vmem:[#allocation2 + $0x80] sm:$0xff]  ;;  %v1930_v13 = vld [vmem:[#allocation2 + $0xd8] sm:$0xff] }
 0x22d   :  { %v4068_v8 = vadd.f32 %v1646_v14, %v5077_v26  ;;  %v1648_v52 = vpop.f32.mrb[15].mxu0  ;;  %3825 = vmatpush1.bf16.msra.mxu1 %v3824_v24 }
 0x22e   :  { %v1861_v60 = vmax.f32 %v1819_v20, %v1820_v16  ;;  %v4069_v9 = vadd.f32 %v1648_v52, %v5079_v27  ;;  %v5198_v0 = vmax.f32 %v1881_v25, 0.0  ;;  %3827 = vmatprep.subr.bf16.mxu1 %v3826_v51  ;;  %v3832_v27 = vpack.c.bf16 %v1917_v45, %v1915_v10  ;;  %v1921_v51 = vld [vmem:[#allocation2 + $0x90] sm:$0xff]  ;;  %v1926_v20 = vld [vmem:[#allocation2 + $0xb8] sm:$0xff]  ;;  %v1923_v10 = vld [vmem:[#allocation2 + $0xa0] sm:$0xff] }
 0x22f   :  { %v1821_v59 = vadd.f32 %v4068_v8, %v5154_v15  ;;  %v3836_v8 = vpack.c.bf16 %v1921_v51, %v1919_v17  ;;  %v1925_v45 = vld [vmem:[#allocation2 + $0xb0] sm:$0xff]  ;;  %v1932_v17 = vld [vmem:[#allocation2 + $0xe8] sm:$0xff]  ;;  %v1934_v51 = vld [vmem:[#allocation2 + $0xf8] sm:$0xff] }
 0x230   :  { %v1822_v58 = vadd.f32 %v4069_v9, %v5158_v18  ;;  %v1652_v11 = vpop.f32.mrb[16].mxu0  ;;  %2039 = vmatmul.mubr.f32.gmra.mrb[50].mxu1 %v5198_v0 }
 0x231   :  { %v4070_v26 = vadd.f32 %v1652_v11, %v5081_v28  ;;  %v1654_v14 = vpop.f32.mrb[17].mxu0  ;;  %2044 = vmatprep.mubr.f32.mxu1 %v5675_v12  ;;  %3829 = vmatpush1.bf16.msra.mxu1 %v3828_v36 }
 0x232   :  { %v1862_v52 = vmax.f32 %v1821_v59, %v1822_v58  ;;  %v4071_v24 = vadd.f32 %v1654_v14, %v5083_v29  ;;  %3831 = vmatprep.subr.bf16.mxu1 %v3830_v44  ;;  %v3838_v44 = vpack.c.bf16 %v1926_v20, %v1924_v7 }
 0x233   :  { %v1823_v34 = vadd.f32 %v4070_v26, %v5154_v15 }
 0x234   :  { %v1882_v35 = vmax.f32 %v1861_v60, %v1862_v52  ;;  %v1824_v23 = vadd.f32 %v4071_v24, %v5158_v18  ;;  %v1658_v28 = vpop.f32.mrb[18].mxu0  ;;  %v1928_v60 = vld [vmem:[#allocation2 + $0xc8] sm:$0xff]  ;;  %v1927_v52 = vld [vmem:[#allocation2 + $0xc0] sm:$0xff]  ;;  %v1929_v24 = vld [vmem:[#allocation2 + $0xd0] sm:$0xff] }
 0x235   :  { %v4072_v16 = vadd.f32 %v1658_v28, %v5085_v30  ;;  %v1660_v25 = vpop.f32.mrb[19].mxu0  ;;  %3833 = vmatpush1.bf16.msra.mxu1 %v3832_v27  ;;  %v3842_v27 = vpack.c.bf16 %v1930_v13, %v1928_v60 }
 0x236   :  { %v5209_v36 = vmax.f32 %v1882_v35, 0.0  ;;  %v1863_v29 = vmax.f32 %v1823_v34, %v1824_v23  ;;  %v4073_v9 = vadd.f32 %v1660_v25, %v5087_v31  ;;  %3835 = vmatprep.subr.bf16.mxu1 %v3834_v33  ;;  %v3840_v31 = vpack.c.bf16 %v1925_v45, %v1923_v10  ;;  %v2198_v10 = vld [vmem:[#allocation2 + $0x218] sm:$0xff] }
 0x237   :  { %v1825_v59 = vadd.f32 %v4072_v16, %v5154_v15  ;;  %v3844_v23 = vpack.c.bf16 %v1929_v24, %v1927_v52  ;;  %v3846_v25 = vpack.c.bf16 %v1934_v51, %v1932_v17 }
 0x238   :  { %v1826_v22 = vadd.f32 %v4073_v9, %v5158_v18  ;;  %v1664_v58 = vpop.f32.mrb[20].mxu0  ;;  %2045 = vmatmul.mubr.f32.gmra.mrb[52].mxu1 %v5209_v36  ;;  %v1933_v9 = vld [vmem:[#allocation2 + $0xf0] sm:$0xff] }
 0x239   :  { %v4074_v30 = vadd.f32 %v1664_v58, %v5089_v32  ;;  %v1666_v11 = vpop.f32.mrb[21].mxu0  ;;  %2050 = vmatprep.mubr.f32.mxu1 %v5675_v12  ;;  %3837 = vmatpush1.bf16.msra.mxu1 %v3836_v8  ;;  %v1931_v8 = vld [vmem:[#allocation2 + $0xe0] sm:$0xff] }
 0x23a   :  { %v1864_v26 = vmax.f32 %v1825_v59, %v1826_v22  ;;  %v4075_v14 = vadd.f32 %v1666_v11, %v5091_v53  ;;  %3839 = vmatprep.subr.bf16.mxu1 %v3838_v44 }
 0x23b   :  { %v1827_v33 = vadd.f32 %v4074_v30, %v5154_v15 }
 0x23c   :  { %v1883_v34 = vmax.f32 %v1863_v29, %v1864_v26  ;;  %v1828_v7 = vadd.f32 %v4075_v14, %v5158_v18  ;;  %v1670_v32 = vpop.f32.mrb[22].mxu0  ;;  %v2196_v29 = vld [vmem:[#allocation2 + $0x208] sm:$0xff] }
 0x23d   :  { %v4076_v20 = vadd.f32 %v1670_v32, %v5093_v54  ;;  %v1672_v35 = vpop.f32.mrb[23].mxu0  ;;  %3841 = vmatpush1.bf16.msra.mxu1 %v3840_v31  ;;  %v3850_v58 = vpack.c.bf16 %v2198_v10, %v2196_v29 }
 0x23e   :  { %v5221_v28 = vmax.f32 %v1883_v34, 0.0  ;;  %v1865_v53 = vmax.f32 %v1827_v33, %v1828_v7  ;;  %v4077_v16 = vadd.f32 %v1672_v35, %v5095_v55  ;;  %3843 = vmatprep.subr.bf16.mxu1 %v3842_v27  ;;  %v3848_v55 = vpack.c.bf16 %v1933_v9, %v1931_v8 }
 0x23f   :  { %v1829_v44 = vadd.f32 %v4076_v20, %v5154_v15 }
 0x240   :  { %v1830_v45 = vadd.f32 %v4077_v16, %v5158_v18  ;;  %v1676_v59 = vpop.f32.mrb[24].mxu0  ;;  %2051 = vmatmul.mubr.f32.gmra.mrb[54].mxu1 %v5221_v28 }
 0x241   :  { %v4078_v54 = vadd.f32 %v1676_v59, %v5097_v56  ;;  %v1678_v60 = vpop.f32.mrb[25].mxu0  ;;  %2056 = vmatprep.mubr.f32.mxu1 %v5675_v12  ;;  %3845 = vmatpush1.bf16.msra.mxu1 %v3844_v23 }
 0x242   :  { %v1866_v13 = vmax.f32 %v1829_v44, %v1830_v45  ;;  %v4079_v22 = vadd.f32 %v1678_v60, %v5099_v57  ;;  %3847 = vmatprep.subr.bf16.mxu1 %v3846_v25 }
 0x243   :  { %v1831_v30 = vadd.f32 %v4078_v54, %v5154_v15 }
 0x244   :  { %v1884_v11 = vmax.f32 %v1865_v53, %v1866_v13  ;;  %v1832_v31 = vadd.f32 %v4079_v22, %v5158_v18  ;;  %v1682_v26 = vpop.f32.mrb[26].mxu0 }
 0x245   :  { %v4080_v14 = vadd.f32 %v1682_v26, %v5101_v61  ;;  %v1684_v27 = vpop.f32.mrb[27].mxu0  ;;  %3849 = vmatpush1.bf16.msra.mxu1 %v3848_v55 }
 0x246   :  { %v5233_v56 = vmax.f32 %v1884_v11, 0.0  ;;  %v1867_v52 = vmax.f32 %v1831_v30, %v1832_v31  ;;  %v4081_v24 = vadd.f32 %v1684_v27, %v5103_v62  ;;  %3851 = vmatprep.subr.bf16.mxu1 %v3850_v58 }
 0x247   :  { %v1833_v57 = vadd.f32 %v4080_v14, %v5154_v15 }
 0x248   :  { %v1834_v33 = vadd.f32 %v4081_v24, %v5158_v18  ;;  %v1688_v17 = vpop.f32.mrb[28].mxu0  ;;  %2057 = vmatmul.mubr.f32.gmra.mrb[56].mxu1 %v5233_v56 }
 0x249   :  { %v4082_v51 = vadd.f32 %v1688_v17, %v5105_v63  ;;  %v1690_v34 = vpop.f32.mrb[29].mxu0  ;;  %2062 = vmatprep.mubr.f32.mxu1 %v5675_v12 }
 0x24a   :  { %v1868_v61 = vmax.f32 %v1833_v57, %v1834_v33  ;;  %v4083_v7 = vadd.f32 %v1690_v34, %v5107_v1  ;;  %v2197_v34 = vld [vmem:[#allocation2 + $0x210] sm:$0xff] }
 0x24b   :  { %v1835_v32 = vadd.f32 %v4082_v51, %v5154_v15  ;;  %v2195_v51 = vld [vmem:[#allocation2 + $0x200] sm:$0xff] }
 0x24c   :  { %v1885_v20 = vmax.f32 %v1867_v52, %v1868_v61  ;;  %v1836_v62 = vadd.f32 %v4083_v7, %v5158_v18  ;;  %v1694_v35 = vpop.f32.mrb[30].mxu0  ;;  %v2200_v7 = vld [vmem:[#allocation2 + $0x228] sm:$0xff] }
 0x24d   :  { %v4084_v23 = vadd.f32 %v1694_v35, %v5109_v2  ;;  %v1696_v53 = vpop.f32.mrb[31].mxu0  ;;  %v3852_v35 = vpack.c.bf16 %v2197_v34, %v2195_v51  ;;  %v5677_v34 = vld [vmem:[#allocation5_spill] sm:$0xff] }
 0x24e   :  { %v5245_v16 = vmax.f32 %v1885_v20, 0.0  ;;  %v1869_v25 = vmax.f32 %v1835_v32, %v1836_v62  ;;  %v4085_v63 = vadd.f32 %v1696_v53, %v5111_v3 }
 0x24f   :  { %v1837_v8 = vadd.f32 %v4084_v23, %v5154_v15  ;;  %v1891_v23 = vmax.f32 %v5171_v21, 0.0 }
 0x250   :  { %v1838_v9 = vadd.f32 %v4085_v63, %v5158_v18  ;;  %v1700_v44 = vpop.f32.mrb[32].mxu0  ;;  %2063 = vmatmul.mubr.f32.gmra.mrb[58].mxu1 %v5245_v16  ;;  %v2199_v63 = vld [vmem:[#allocation2 + $0x220] sm:$0xff] }
 0x251   :  { %v4086_v1 = vadd.f32 %v1700_v44, %v5113_v4  ;;  %v1702_v29 = vpop.f32.mrb[33].mxu0  ;;  %2068 = vmatprep.mubr.f32.mxu1 %v5675_v12  ;;  %v2204_v44 = vld [vmem:[#allocation2 + $0x248] sm:$0xff] }
 0x252   :  { %v1870_v10 = vmax.f32 %v1837_v8, %v1838_v9  ;;  %v4087_v2 = vadd.f32 %v1702_v29, %v5115_v5  ;;  %v2201_v8 = vld [vmem:[#allocation2 + $0x230] sm:$0xff] }
 0x253   :  { %v1839_v45 = vadd.f32 %v4086_v1, %v5154_v15  ;;  %v2206_v1 = vld [vmem:[#allocation2 + $0x258] sm:$0xff] }
 0x254   :  { %v1886_v59 = vmax.f32 %v1869_v25, %v1870_v10  ;;  %v1840_v3 = vadd.f32 %v4087_v2, %v5158_v18  ;;  %v1706_v54 = vpop.f32.mrb[34].mxu0 }
 0x255   :  { %v4088_v60 = vadd.f32 %v1706_v54, %v5117_v6  ;;  %v1708_v55 = vpop.f32.mrb[35].mxu0  ;;  %v2203_v54 = vld [vmem:[#allocation2 + $0x240] sm:$0xff] }
 0x256   :  { %v5257_v13 = vmax.f32 %v1886_v59, 0.0  ;;  %v1871_v22 = vmax.f32 %v1839_v45, %v1840_v3  ;;  %v4089_v4 = vadd.f32 %v1708_v55, %v5119_v37  ;;  %v3858_v3 = vpack.c.bf16 %v2206_v1, %v2204_v44  ;;  %v2219_v44 = vld [vmem:[#allocation2 + $0x2c0] sm:$0xff]  ;;  %v2221_v1 = vld [vmem:[#allocation2 + $0x2d0] sm:$0xff] }
 0x257   :  { %v1841_v58 = vadd.f32 %v4088_v60, %v5154_v15  ;;  %v2205_v60 = vld [vmem:[#allocation2 + $0x250] sm:$0xff] }
 0x258   :  { %v1842_v30 = vadd.f32 %v4089_v4, %v5158_v18  ;;  %v1712_v11 = vpop.f32.mrb[36].mxu0  ;;  %2069 = vmatmul.mubr.f32.gmra.mrb[60].mxu1 %v5257_v13  ;;  %v2210_v4 = vld [vmem:[#allocation2 + $0x278] sm:$0xff] }
 0x259   :  { %v4090_v5 = vadd.f32 %v1712_v11, %v5121_v38  ;;  %v1714_v31 = vpop.f32.mrb[37].mxu0  ;;  %2074 = vmatprep.mubr.f32.mxu1 %v5675_v12 }
 0x25a   :  { %v1872_v26 = vmax.f32 %v1841_v58, %v1842_v30  ;;  %v4091_v6 = vadd.f32 %v1714_v31, %v5123_v39  ;;  %v2202_v39 = vld [vmem:[#allocation2 + $0x238] sm:$0xff] }
 0x25b   :  { %v1843_v14 = vadd.f32 %v4090_v5, %v5154_v15  ;;  %v3854_v25 = vpack.c.bf16 %v2202_v39, %v2200_v7  ;;  %v2211_v39 = vld [vmem:[#allocation2 + $0x280] sm:$0xff] }
 0x25c   :  { %v1887_v27 = vmax.f32 %v1871_v22, %v1872_v26  ;;  %v1844_v37 = vadd.f32 %v4091_v6, %v5158_v18  ;;  %v1718_v52 = vpop.f32.mrb[38].mxu0  ;;  %v2208_v22 = vld [vmem:[#allocation2 + $0x268] sm:$0xff] }
 0x25d   :  { %v4092_v24 = vadd.f32 %v1718_v52, %v5125_v40  ;;  %v1720_v57 = vpop.f32.mrb[39].mxu0  ;;  %v3862_v6 = vpack.c.bf16 %v2210_v4, %v2208_v22  ;;  %v2212_v52 = vld [vmem:[#allocation2 + $0x288] sm:$0xff]  ;;  %v2359_v22 = vld [vmem:[#allocation2 + $0x310] sm:$0xff] }
 0x25e   :  { %v5269_v33 = vmax.f32 %v1887_v27, 0.0  ;;  %v1873_v17 = vmax.f32 %v1843_v14, %v1844_v37  ;;  %v4093_v38 = vadd.f32 %v1720_v57, %v5127_v41  ;;  %v2207_v14 = vld [vmem:[#allocation2 + $0x260] sm:$0xff]  ;;  %v2209_v27 = vld [vmem:[#allocation2 + $0x270] sm:$0xff]  ;;  %v2362_v4 = vld [vmem:[#allocation2 + $0x328] sm:$0xff] }
 0x25f   :  { %v1845_v61 = vadd.f32 %v4092_v24, %v5154_v15  ;;  %v2214_v24 = vld [vmem:[#allocation2 + $0x298] sm:$0xff] }
 0x260   :  { %v1846_v32 = vadd.f32 %v4093_v38, %v5158_v18  ;;  %v1724_v20 = vpop.f32.mrb[40].mxu0  ;;  %2075 = vmatmul.mubr.f32.gmra.mrb[62].mxu1 %v5269_v33  ;;  %v3866_v7 = vpack.c.bf16 %v2214_v24, %v2212_v52  ;;  %v2372_v52 = vld [vmem:[#allocation2 + $0x378] sm:$0xff] }
 0x261   :  { %v4094_v62 = vadd.f32 %v1724_v20, %v5129_v42  ;;  %v1726_v40 = vpop.f32.mrb[41].mxu0  ;;  %2145 = vmatprep.mubr.f32.mxu1 %v5675_v12 }
 0x262   :  { %v1874_v41 = vmax.f32 %v1845_v61, %v1846_v32  ;;  %v4095_v53 = vadd.f32 %v1726_v40, %v5131_v43  ;;  %v3856_v43 = vpack.c.bf16 %v2201_v8, %v2199_v63  ;;  %v2213_v32 = vld [vmem:[#allocation2 + $0x290] sm:$0xff]  ;;  %v2218_v40 = vld [vmem:[#allocation2 + $0x2b8] sm:$0xff]  ;;  %v2220_v63 = vld [vmem:[#allocation2 + $0x2c8] sm:$0xff] }
 0x263   :  { %v1847_v9 = vadd.f32 %v4094_v62, %v5154_v15  ;;  %v2216_v62 = vld [vmem:[#allocation2 + $0x2a8] sm:$0xff]  ;;  %v2222_v8 = vld [vmem:[#allocation2 + $0x2d8] sm:$0xff] }
 0x264   :  { %v1848_v29 = vadd.f32 %v4095_v53, %v5158_v18  ;;  %v1730_v10 = vpop.f32.mrb[42].mxu0  ;;  %2146 = vmatmul.mubr.f32.vlgmr.msra.gmra.mrb[48].mxu1 %v1891_v23  ;;  %v5281_v42 = vmax.f32 %v1873_v17, %v1874_v41  ;;  %v3870_v41 = vpack.c.bf16 %v2218_v40, %v2216_v62  ;;  %v2215_v53 = vld [vmem:[#allocation2 + $0x2a0] sm:$0xff]  ;;  %v2379_v40 = vld [vmem:[#allocation2 + $0x3b0] sm:$0xff] }
 0x265   :  { %v4096_v2 = vadd.f32 %v1730_v10, %v5133_v46  ;;  %v1732_v45 = vpop.f32.mrb[43].mxu0  ;;  %3853 = vmatpush1.bf16.msra.mxu1 %v3852_v35  ;;  %2151 = vmatprep.mubr.f32.mxu1 %v5675_v12  ;;  %v5676_v46 = vmax.f32 %v5181_v19, 0.0  ;;  %v2226_v10 = vld [vmem:[#allocation2 + $0x2f8] sm:$0xff]  ;;  %v2377_v62 = vld [vmem:[#allocation2 + $0x3a0] sm:$0xff] }
 0x266   :  { %v1875_v21 = vmax.f32 %v1847_v9, %v1848_v29  ;;  %v4097_v59 = vadd.f32 %v1732_v45, %v5135_v47  ;;  %3855 = vmatprep.subr.bf16.mxu1 %v3854_v25  ;;  %v3860_v47 = vpack.c.bf16 %v2205_v60, %v2203_v54  ;;  %v2217_v25 = vld [vmem:[#allocation2 + $0x2b0] sm:$0xff]  ;;  %v3874_v9 = vpack.c.bf16 %v2222_v8, %v2220_v63  ;;  %v2224_v29 = vld [vmem:[#allocation2 + $0x2e8] sm:$0xff]  ;;  %v2388_v8 = vld [vmem:[#allocation2 + $0x3f8] sm:$0xff] }
 0x267   :  { %v1849_v55 = vadd.f32 %v4096_v2, %v5154_v15  ;;  %v3876_v2 = vpack.c.bf16 %v2221_v1, %v2219_v44  ;;  %v3878_v45 = vpack.c.bf16 %v2226_v10, %v2224_v29  ;;  %v2386_v63 = vld [vmem:[#allocation2 + $0x3e8] sm:$0xff]  ;;  %v2385_v44 = vld [vmem:[#allocation2 + $0x3e0] sm:$0xff]  ;;  %v2387_v1 = vld [vmem:[#allocation2 + $0x3f0] sm:$0xff] }
 0x268   :  { %v1850_v58 = vadd.f32 %v4097_v59, %v5158_v18  ;;  %v1736_v30 = vpop.f32.mrb[44].mxu0  ;;  %2152 = vmatmul.mubr.f32.gmra.mrb[50].mxu1 %v5676_v46  ;;  %v2358_v59 = vld [vmem:[#allocation2 + $0x308] sm:$0xff]  ;;  %v2522_v10 = vld [vmem:[#allocation2 + $0x418] sm:$0xff] }
 0x269   :  { %v4098_v11 = vadd.f32 %v1736_v30, %v5137_v48  ;;  %v1738_v5 = vpop.f32.mrb[45].mxu0  ;;  %3857 = vmatpush1.bf16.msra.mxu1 %v3856_v43  ;;  %2157 = vmatprep.mubr.f32.mxu1 %v5675_v12  ;;  %v2223_v43 = vld [vmem:[#allocation2 + $0x2e0] sm:$0xff]  ;;  %v2520_v29 = vld [vmem:[#allocation2 + $0x408] sm:$0xff] }
 0x26a   :  { %v1876_v31 = vmax.f32 %v1849_v55, %v1850_v58  ;;  %v4099_v26 = vadd.f32 %v1738_v5, %v5139_v49  ;;  %3859 = vmatprep.subr.bf16.mxu1 %v3858_v3  ;;  %v3864_v49 = vpack.c.bf16 %v2209_v27, %v2207_v14  ;;  %v2360_v3 = vld [vmem:[#allocation2 + $0x318] sm:$0xff]  ;;  %v2357_v55 = vld [vmem:[#allocation2 + $0x300] sm:$0xff]  ;;  %v2363_v5 = vld [vmem:[#allocation2 + $0x330] sm:$0xff] }
 0x26b   :  { %v1851_v37 = vadd.f32 %v4098_v11, %v5154_v15  ;;  %v3882_v60 = vpack.c.bf16 %v2360_v3, %v2358_v59  ;;  %v2364_v58 = vld [vmem:[#allocation2 + $0x338] sm:$0xff]  ;;  %v3884_v30 = vpack.c.bf16 %v2359_v22, %v2357_v55  ;;  %v2361_v11 = vld [vmem:[#allocation2 + $0x320] sm:$0xff]  ;;  %v2367_v27 = vld [vmem:[#allocation2 + $0x350] sm:$0xff] }
 0x26c   :  { %v1852_v19 = vadd.f32 %v4099_v26, %v5158_v18  ;;  %v1742_v57 = vpop.f32.mrb[46].mxu0  ;;  %2158 = vmatmul.mubr.f32.gmra.mrb[52].mxu1 %v5198_v0  ;;  %v5296_v48 = vmax.f32 %v1875_v21, %v1876_v31  ;;  %v2225_v21 = vld [vmem:[#allocation2 + $0x2f0] sm:$0xff]  ;;  %v3886_v46 = vpack.c.bf16 %v2364_v58, %v2362_v4  ;;  %v2368_v31 = vld [vmem:[#allocation2 + $0x358] sm:$0xff]  ;;  %v3888_v26 = vpack.c.bf16 %v2363_v5, %v2361_v11  ;;  %v2365_v14 = vld [vmem:[#allocation2 + $0x340] sm:$0xff] }
 0x26d   :  { %v4100_v17 = vadd.f32 %v1742_v57, %v5141_v50  ;;  %v1744_v38 = vpop.f32.mrb[47].mxu0  ;;  %3861 = vmatpush1.bf16.msra.mxu1 %v3860_v47  ;;  %2163 = vmatprep.mubr.f32.mxu1 %v5675_v12  ;;  %v3868_v50 = vpack.c.bf16 %v2213_v32, %v2211_v39  ;;  %v3880_v54 = vpack.c.bf16 %v2225_v21, %v2223_v43  ;;  %v2366_v47 = vld [vmem:[#allocation2 + $0x348] sm:$0xff]  ;;  %v2369_v57 = vld [vmem:[#allocation2 + $0x360] sm:$0xff]  ;;  %v2380_v39 = vld [vmem:[#allocation2 + $0x3b8] sm:$0xff] }
 0x26e   :  { %v1877_v51 = vmax.f32 %v1851_v37, %v1852_v19  ;;  %v4101_v61 = vadd.f32 %v1744_v38, %v5677_v34  ;;  %3863 = vmatprep.subr.bf16.mxu1 %v3862_v6  ;;  %v3890_v6 = vpack.c.bf16 %v2368_v31, %v2366_v47  ;;  %v2370_v37 = vld [vmem:[#allocation2 + $0x368] sm:$0xff]  ;;  %v3892_v24 = vpack.c.bf16 %v2367_v27, %v2365_v14  ;;  %v2376_v38 = vld [vmem:[#allocation2 + $0x398] sm:$0xff]  ;;  %v2373_v34 = vld [vmem:[#allocation2 + $0x380] sm:$0xff] }
 0x26f   :  { %v1853_v20 = vadd.f32 %v4100_v17, %v5154_v15  ;;  %v3894_v19 = vpack.c.bf16 %v2372_v52, %v2370_v37  ;;  %v2374_v17 = vld [vmem:[#allocation2 + $0x388] sm:$0xff]  ;;  %v3914_v43 = vpack.c.bf16 %v2522_v10, %v2520_v29  ;;  %v2519_v21 = vld [vmem:[#allocation2 + $0x400] sm:$0xff]  ;;  %v2521_v59 = vld [vmem:[#allocation2 + $0x410] sm:$0xff] }
 0x270   :  { %v1854_v35 = vadd.f32 %v4101_v61, %v5158_v18  ;;  %2164 = vmatmul.mubr.f32.gmra.mrb[54].mxu1 %v5209_v36  ;;  %v3872_v18 = vpack.c.bf16 %v2217_v25, %v2215_v53  ;;  %v2375_v61 = vld [vmem:[#allocation2 + $0x390] sm:$0xff]  ;;  %v2381_v53 = vld [vmem:[#allocation2 + $0x3c0] sm:$0xff]  ;;  %v2524_v3 = vld [vmem:[#allocation2 + $0x428] sm:$0xff] }
 0x271   :  { %3865 = vmatpush1.bf16.msra.mxu1 %v3864_v49  ;;  %2169 = vmatprep.mubr.f32.mxu1 %v5675_v12  ;;  %v3900_v32 = vpack.c.bf16 %v2375_v61, %v2373_v34  ;;  %v2383_v25 = vld [vmem:[#allocation2 + $0x3d0] sm:$0xff]  ;;  %v2523_v22 = vld [vmem:[#allocation2 + $0x420] sm:$0xff]  ;;  %v2528_v58 = vld [vmem:[#allocation2 + $0x448] sm:$0xff] }
 0x272   :  { %v1878_v23 = vmax.f32 %v1853_v20, %v1854_v35  ;;  %3867 = vmatprep.subr.bf16.mxu1 %v3866_v7  ;;  %v2378_v7 = vld [vmem:[#allocation2 + $0x3a8] sm:$0xff]  ;;  %v2525_v4 = vld [vmem:[#allocation2 + $0x430] sm:$0xff]  ;;  %v2527_v11 = vld [vmem:[#allocation2 + $0x440] sm:$0xff] }
 0x273   :  { %v3902_v20 = vpack.c.bf16 %v2380_v39, %v2378_v7  ;;  %v2382_v35 = vld [vmem:[#allocation2 + $0x3c8] sm:$0xff]  ;;  %v2529_v5 = vld [vmem:[#allocation2 + $0x450] sm:$0xff]  ;;  %v2534_v31 = vld [vmem:[#allocation2 + $0x478] sm:$0xff] }
 0x274   :  { %2170 = vmatmul.mubr.f32.gmra.mrb[56].mxu1 %v5221_v28  ;;  %v5306_v15 = vmax.f32 %v1877_v51, %v1878_v23  ;;  %v3898_v51 = vpack.c.bf16 %v2376_v38, %v2374_v17  ;;  %v3904_v23 = vpack.c.bf16 %v2379_v40, %v2377_v62  ;;  %v2532_v47 = vld [vmem:[#allocation2 + $0x468] sm:$0xff]  ;;  %v2531_v14 = vld [vmem:[#allocation2 + $0x460] sm:$0xff]  ;;  %v2538_v37 = vld [vmem:[#allocation2 + $0x498] sm:$0xff] }
 0x275   :  { %3869 = vmatpush1.bf16.msra.mxu1 %v3868_v50  ;;  %2175 = vmatprep.mubr.f32.mxu1 %v5675_v12  ;;  %v2384_v50 = vld [vmem:[#allocation2 + $0x3d8] sm:$0xff]  ;;  %v2536_v27 = vld [vmem:[#allocation2 + $0x488] sm:$0xff]  ;;  %v2541_v34 = vld [vmem:[#allocation2 + $0x4b0] sm:$0xff] }
 0x276   :  { %3871 = vmatprep.subr.bf16.mxu1 %v3870_v41  ;;  %v3906_v41 = vpack.c.bf16 %v2384_v50, %v2382_v35  ;;  %v2542_v17 = vld [vmem:[#allocation2 + $0x4b8] sm:$0xff]  ;;  %v2544_v61 = vld [vmem:[#allocation2 + $0x4c8] sm:$0xff]  ;;  %v2545_v62 = vld [vmem:[#allocation2 + $0x4d0] sm:$0xff] }
 0x277   :  { %v2546_v7 = vld [vmem:[#allocation2 + $0x4d8] sm:$0xff]  ;;  %v2548_v40 = vld [vmem:[#allocation2 + $0x4e8] sm:$0xff]  ;;  %v3453_v10 = vld [vmem:[%s5659_s5 + $0xa0] sm:$0xff] }
 0x278   :  { %2176 = vmatmul.mubr.f32.gmra.mrb[58].mxu1 %v5233_v56  ;;  %v2550_v35 = vld [vmem:[#allocation2 + $0x4f8] sm:$0xff] }
 0x279   :  { %3873 = vmatpush1.bf16.msra.mxu1 %v3872_v18  ;;  %2181 = vmatprep.mubr.f32.mxu1 %v5675_v12  ;;  %v3908_v18 = vpack.c.bf16 %v2383_v25, %v2381_v53  ;;  %v2549_v53 = vld [vmem:[#allocation2 + $0x4f0] sm:$0xff] }
 0x27a   :  { %3875 = vmatprep.subr.bf16.mxu1 %v3874_v9  ;;  %v3910_v9 = vpack.c.bf16 %v2388_v8, %v2386_v63  ;;  %v1901_v63 = vmax.f32 %v5296_v48, 0.0  ;;  %v3449_v8 = vld [vmem:[%s5659_s5 + $0x80] sm:$0xff]  ;;  %v3451_v48 = vld [vmem:[%s5659_s5 + $0x90] sm:$0xff] }
 0x27c   :  { %2182 = vmatmul.mubr.f32.gmra.mrb[60].mxu1 %v5245_v16 }
 0x27d   :  { %3877 = vmatpush1.bf16.msra.mxu1 %v3876_v2  ;;  %2187 = vmatprep.mubr.f32.mxu1 %v5675_v12  ;;  %v3912_v2 = vpack.c.bf16 %v2387_v1, %v2385_v44  ;;  %v4350_v44 = vmov 0.0|0.0   ;;  %v3452_v1 = vld [vmem:[%s5659_s5 + $0x98] sm:$0xff] }
 0x27e   :  { %3879 = vmatprep.subr.bf16.mxu1 %v3878_v45  ;;  %v5330_v45 = vmax.f32 %v5281_v42, 0.0  ;;  %v3920_v42 = vpack.c.bf16 %v2525_v4, %v2523_v22  ;;  %v3950_v29 = vpack.c.bf16 %v3452_v1, %v3451_v48  ;;  %v3463_v22 = vld [vmem:[%s5659_s5 + $0xf0] sm:$0xff]  ;;  %v3464_v4 = vld [vmem:[%s5659_s5 + $0xf8] sm:$0xff] }
 0x280   :  { %2188 = vmatmul.mubr.f32.gmra.mrb[62].mxu1 %v5257_v13 }
 0x281   :  { %3881 = vmatpush1.bf16.msra.mxu1 %v3880_v54  ;;  %2291 = vmatprep.mubr.f32.mxu1 %v5675_v12  ;;  %v2526_v54 = vld [vmem:[#allocation2 + $0x438] sm:$0xff] }
 0x282   :  { %3883 = vmatprep.subr.bf16.mxu1 %v3882_v60  ;;  %v3916_v60 = vpack.c.bf16 %v2521_v59, %v2519_v21  ;;  %v3918_v55 = vpack.c.bf16 %v2526_v54, %v2524_v3  ;;  %v3459_v21 = vld [vmem:[%s5659_s5 + $0xd0] sm:$0xff]  ;;  %v3460_v59 = vld [vmem:[%s5659_s5 + $0xd8] sm:$0xff]  ;;  %v3461_v54 = vld [vmem:[%s5659_s5 + $0xe0] sm:$0xff] }
 0x283   :  { %v3962_v3 = vpack.c.bf16 %v3460_v59, %v3459_v21 }
 0x284   :  { %2292 = vmatmul.mubr.f32.vlgmr.msra.gmra.mrb[48].mxu1 %v5198_v0  ;;  %v2371_v0 = vld [vmem:[#allocation2 + $0x370] sm:$0xff] }
 0x285   :  { %3885 = vmatpush1.bf16.msra.mxu1 %v3884_v30  ;;  %2297 = vmatprep.mubr.f32.mxu1 %v5675_v12  ;;  %v3896_v49 = vpack.c.bf16 %v2371_v0, %v2369_v57  ;;  %v2530_v30 = vld [vmem:[#allocation2 + $0x458] sm:$0xff]  ;;  %v2537_v57 = vld [vmem:[#allocation2 + $0x490] sm:$0xff]  ;;  %v2540_v0 = vld [vmem:[#allocation2 + $0x4a8] sm:$0xff] }
 0x286   :  { %3887 = vmatprep.subr.bf16.mxu1 %v3886_v46  ;;  %v3922_v46 = vpack.c.bf16 %v2530_v30, %v2528_v58  ;;  %v3968_v58 = vpack.c.bf16 %v3464_v4, %v3463_v22  ;;  %v2680_v30 = vld [vmem:[%s5658_s4] sm:$0x3] }
 0x288   :  { %2298 = vmatmul.mubr.f32.gmra.mrb[50].mxu1 %v5209_v36 }
 0x289   :  { %3889 = vmatpush1.bf16.msra.mxu1 %v3888_v26  ;;  %2303 = vmatprep.mubr.f32.mxu1 %v5675_v12  ;;  %v3924_v26 = vpack.c.bf16 %v2529_v5, %v2527_v11 }
 0x28a   :  { %3891 = vmatprep.subr.bf16.mxu1 %v3890_v6  ;;  %v3926_v6 = vpack.c.bf16 %v2534_v31, %v2532_v47 }
 0x28c   :  { %2304 = vmatmul.mubr.f32.gmra.mrb[52].mxu1 %v5221_v28 }
 0x28d   :  { %3893 = vmatpush1.bf16.msra.mxu1 %v3892_v24  ;;  %2309 = vmatprep.mubr.f32.mxu1 %v5675_v12  ;;  %v3930_v24 = vpack.c.bf16 %v2538_v37, %v2536_v27 }
 0x28e   :  { %3895 = vmatprep.subr.bf16.mxu1 %v3894_v19  ;;  %v2535_v19 = vld [vmem:[#allocation2 + $0x480] sm:$0xff] }
 0x28f   :  { %v3932_v38 = vpack.c.bf16 %v2537_v57, %v2535_v19 }
 0x290   :  { %2310 = vmatmul.mubr.f32.gmra.mrb[54].mxu1 %v5233_v56 }
 0x291   :  { %3897 = vmatpush1.bf16.msra.mxu1 %v3896_v49  ;;  %2315 = vmatprep.mubr.f32.mxu1 %v5675_v12  ;;  %v3934_v49 = vpack.c.bf16 %v2542_v17, %v2540_v0 }
 0x292   :  { %3899 = vmatprep.subr.bf16.mxu1 %v3898_v51  ;;  %v2539_v51 = vld [vmem:[#allocation2 + $0x4a0] sm:$0xff] }
 0x293   :  { %v3936_v39 = vpack.c.bf16 %v2541_v34, %v2539_v51 }
 0x294   :  { %2316 = vmatmul.mubr.f32.gmra.mrb[56].mxu1 %v5245_v16 }
 0x295   :  { %3901 = vmatpush1.bf16.msra.mxu1 %v3900_v32  ;;  %2321 = vmatprep.mubr.f32.mxu1 %v5675_v12  ;;  %v3938_v32 = vpack.c.bf16 %v2546_v7, %v2544_v61 }
 0x296   :  { %3903 = vmatprep.subr.bf16.mxu1 %v3902_v20  ;;  %v2543_v20 = vld [vmem:[#allocation2 + $0x4c0] sm:$0xff] }
 0x297   :  { %v3940_v50 = vpack.c.bf16 %v2545_v62, %v2543_v20  ;;  %v2724_v62 = vld [vmem:[%s5659_s5] sm:$0xff] }
 0x298   :  { %2322 = vmatmul.mubr.f32.gmra.mrb[58].mxu1 %v5257_v13 }
 0x299   :  { %3905 = vmatpush1.bf16.msra.mxu1 %v3904_v23  ;;  %2327 = vmatprep.mubr.f32.mxu1 %v5675_v12  ;;  %v3942_v23 = vpack.c.bf16 %v2550_v35, %v2548_v40  ;;  %v2725_v40 = vld [vmem:[%s5659_s5 + $0x8] sm:$0xff] }
 0x29a   :  { %3907 = vmatprep.subr.bf16.mxu1 %v3906_v41  ;;  %v2547_v41 = vld [vmem:[#allocation2 + $0x4e0] sm:$0xff] }
 0x29b   :  { %v3944_v25 = vpack.c.bf16 %v2549_v53, %v2547_v41  ;;  %v3971_v53 = vpack.c.bf16 %v2725_v40, %v2724_v62  ;;  %v3475_v40 = vld [vmem:[%s5659_s5 + $0x150] sm:$0xff] }
 0x29c   :  { %2328 = vmatmul.mubr.f32.gmra.mrb[60].mxu1 %v5269_v33 }
 0x29d   :  { %3909 = vmatpush1.bf16.msra.mxu1 %v3908_v18  ;;  %2333 = vmatprep.mubr.f32.mxu1 %v5675_v12  ;;  %v3450_v18 = vld [vmem:[%s5659_s5 + $0x88] sm:$0xff] }
 0x29e   :  { %3911 = vmatprep.subr.bf16.mxu1 %v3910_v9  ;;  %v3947_v9 = vpack.c.bf16 %v3450_v18, %v3449_v8  ;;  %v2726_v18 = vld [vmem:[%s5659_s5 + $0x10] sm:$0xff] }
 0x2a0   :  { %2334 = vmatmul.mubr.f32.gmra.mrb[62].mxu1 %v5330_v45 }
 0x2a1   :  { %3913 = vmatpush1.bf16.msra.mxu1 %v3912_v2  ;;  %2453 = vmatprep.mubr.f32.mxu1 %v5675_v12  ;;  %v3454_v2 = vld [vmem:[%s5659_s5 + $0xa8] sm:$0xff] }
 0x2a2   :  { %3915 = vmatprep.subr.bf16.mxu1 %v3914_v43 }
 0x2a4   :  { %2454 = vmatmul.mubr.f32.vlgmr.msra.gmra.mrb[48].mxu1 %v5209_v36  ;;  %v2533_v36 = vld [vmem:[#allocation2 + $0x470] sm:$0xff] }
 0x2a5   :  { %3917 = vmatpush1.bf16.msra.mxu1 %v3916_v60  ;;  %2459 = vmatprep.mubr.f32.mxu1 %v5675_v12  ;;  %v3928_v52 = vpack.c.bf16 %v2533_v36, %v2531_v14  ;;  %v3462_v60 = vld [vmem:[%s5659_s5 + $0xe8] sm:$0xff] }
 0x2a6   :  { %3919 = vmatprep.subr.bf16.mxu1 %v3918_v55  ;;  %v3965_v55 = vpack.c.bf16 %v3462_v60, %v3461_v54  ;;  %v2731_v54 = vld [vmem:[%s5659_s5 + $0x38] sm:$0xff] }
 0x2a8   :  { %2460 = vmatmul.mubr.f32.gmra.mrb[50].mxu1 %v5221_v28 }
 0x2a9   :  { %3921 = vmatpush1.bf16.msra.mxu1 %v3920_v42  ;;  %2465 = vmatprep.mubr.f32.mxu1 %v5675_v12  ;;  %v5678_v42 = vld [vmem:[#allocation6_spill] sm:$0xff] }
 0x2aa   :  { %3923 = vmatprep.subr.bf16.mxu1 %v3922_v46  ;;  %v5679_v46 = vsub.s32 0, %v5678_v42  ;;  %v5680_v5 = vsub.s32 1, %v5678_v42  ;;  %v2733_v42 = vld [vmem:[%s5659_s5 + $0x48] sm:$0xff] }
 0x2ac   :  { %2466 = vmatmul.mubr.f32.gmra.mrb[52].mxu1 %v5233_v56  ;;  %v2685_v11 = vrot.slane %v2680_v30, %v5679_v46  ;;  %v2689_v47 = vrot.slane %v2680_v30, %v5680_v5  ;;  %v2732_v30 = vld [vmem:[%s5659_s5 + $0x40] sm:$0xff] }
 0x2ad   :  { %3925 = vmatpush1.bf16.msra.mxu1 %v3924_v26  ;;  %2471 = vmatprep.mubr.f32.mxu1 %v5675_v12  ;;  %v3983_v5 = vpack.c.bf16 %v2733_v42, %v2732_v30 }
 0x2ae   :  { %3927 = vmatprep.subr.bf16.mxu1 %v3926_v6 }
 0x2b0   :  { %2472 = vmatmul.mubr.f32.gmra.mrb[54].mxu1 %v5245_v16 }
 0x2b1   :  { %3929 = vmatpush1.bf16.msra.mxu1 %v3928_v52  ;;  %2477 = vmatprep.mubr.f32.mxu1 %v5675_v12 }
 0x2b2   :  { %3931 = vmatprep.subr.bf16.mxu1 %v3930_v24 }
 0x2b4   :  { %2478 = vmatmul.mubr.f32.gmra.mrb[56].mxu1 %v5257_v13 }
 0x2b5   :  { %3933 = vmatpush1.bf16.msra.mxu1 %v3932_v38  ;;  %2483 = vmatprep.mubr.f32.mxu1 %v5675_v12 }
 0x2b6   :  { %3935 = vmatprep.subr.bf16.mxu1 %v3934_v49 }
 0x2b8   :  { %2484 = vmatmul.mubr.f32.gmra.mrb[58].mxu1 %v5269_v33 }
 0x2b9   :  { %3937 = vmatpush1.bf16.msra.mxu1 %v3936_v39  ;;  %2489 = vmatprep.mubr.f32.mxu1 %v5675_v12 }
 0x2ba   :  { %3939 = vmatprep.subr.bf16.mxu1 %v3938_v32 }
 0x2bc   :  { %2490 = vmatmul.mubr.f32.gmra.mrb[60].mxu1 %v5330_v45 }
 0x2bd   :  { %3941 = vmatpush1.bf16.msra.mxu1 %v3940_v50  ;;  %2495 = vmatprep.mubr.f32.mxu1 %v5675_v12 }
 0x2be   :  { %3943 = vmatprep.subr.bf16.mxu1 %v3942_v23 }
 0x2c0   :  { %2496 = vmatmul.mubr.f32.gmra.mrb[62].mxu1 %v1901_v63 }
 0x2c1   :  { %3945 = vmatpush1.bf16.msra.mxu1 %v3944_v25  ;;  %2615 = vmatprep.mubr.f32.mxu1 %v5675_v12 }
 0x2c2   :  { %3946 = vmatprep.subr.bf16.mxu1 %v4350_v44 }
 0x2c4   :  { %2616 = vmatmul.mubr.f32.vlgmr.msra.gmra.mrb[48].mxu1 %v5221_v28  ;;  %v3953_v28 = vpack.c.bf16 %v3454_v2, %v3453_v10 }
 0x2c5   :  { %2621 = vmatprep.mubr.f32.mxu1 %v5675_v12  ;;  %3948 = vmatpush3.bf16.msra.mxu1 %v3947_v9  ;;  %v2727_v9 = vld [vmem:[%s5659_s5 + $0x18] sm:$0xff] }
 0x2c6   :  { %3949 = vmatprep.subr.bf16.mxu1 %v4350_v44  ;;  %v3974_v10 = vpack.c.bf16 %v2727_v9, %v2726_v18  ;;  %v3481_v18 = vld [vmem:[%s5659_s5 + $0x180] sm:$0xff]  ;;  %v3482_v9 = vld [vmem:[%s5659_s5 + $0x188] sm:$0xff] }
 0x2c8   :  { %2622 = vmatmul.mubr.f32.gmra.mrb[50].mxu1 %v5233_v56  ;;  %v1902_v56 = vmax.f32 %v5306_v15, 0.0  ;;  %v3458_v15 = vld [vmem:[%s5659_s5 + $0xc8] sm:$0xff] }
 0x2c9   :  { %2627 = vmatprep.mubr.f32.mxu1 %v5675_v12  ;;  %3951 = vmatpush3.bf16.msra.mxu1 %v3950_v29 }
 0x2ca   :  { %3952 = vmatprep.subr.bf16.mxu1 %v4350_v44 }
 0x2cc   :  { %2628 = vmatmul.mubr.f32.gmra.mrb[52].mxu1 %v5245_v16  ;;  %v3455_v16 = vld [vmem:[%s5659_s5 + $0xb0] sm:$0xff] }
 0x2cd   :  { %2633 = vmatprep.mubr.f32.mxu1 %v5675_v12  ;;  %3954 = vmatpush3.bf16.msra.mxu1 %v3953_v28 }
 0x2ce   :  { %3955 = vmatprep.subr.bf16.mxu1 %v4350_v44 }
 0x2d0   :  { %2634 = vmatmul.mubr.f32.gmra.mrb[54].mxu1 %v5257_v13  ;;  %v3456_v13 = vld [vmem:[%s5659_s5 + $0xb8] sm:$0xff] }
 0x2d1   :  { %2639 = vmatprep.mubr.f32.mxu1 %v5675_v12 }
 0x2d4   :  { %2640 = vmatmul.mubr.f32.gmra.mrb[56].mxu1 %v5269_v33  ;;  %v3956_v33 = vpack.c.bf16 %v3456_v13, %v3455_v16  ;;  %v2729_v16 = vld [vmem:[%s5659_s5 + $0x28] sm:$0xff] }
 0x2d5   :  { %2645 = vmatprep.mubr.f32.mxu1 %v5675_v12 }
 0x2d6   :  { %3957 = vmatpush3.bf16.msra.mxu1 %v3956_v33 }
 0x2d7   :  { %3958 = vmatprep.subr.bf16.mxu1 %v4350_v44 }
 0x2d8   :  { %2646 = vmatmul.mubr.f32.gmra.mrb[58].mxu1 %v5330_v45  ;;  %v3457_v45 = vld [vmem:[%s5659_s5 + $0xc0] sm:$0xff] }
 0x2d9   :  { %2651 = vmatprep.mubr.f32.mxu1 %v5675_v12  ;;  %v3959_v43 = vpack.c.bf16 %v3458_v15, %v3457_v45 }
 0x2db   :  { %3960 = vmatpush3.bf16.msra.mxu1 %v3959_v43 }
 0x2dc   :  { %2652 = vmatmul.mubr.f32.gmra.mrb[60].mxu1 %v1901_v63  ;;  %3961 = vmatprep.subr.bf16.mxu1 %v4350_v44 }
 0x2dd   :  { %2657 = vmatprep.mubr.f32.mxu1 %v5675_v12 }
 0x2df   :  { %3963 = vmatpush3.bf16.msra.mxu1 %v3962_v3  ;;  %v2730_v3 = vld [vmem:[%s5659_s5 + $0x30] sm:$0xff] }
 0x2e0   :  { %2658 = vmatmul.mubr.f32.gmra.mrb[62].mxu1 %v1902_v56  ;;  %3964 = vmatprep.subr.bf16.mxu1 %v4350_v44  ;;  %v2728_v56 = vld [vmem:[%s5659_s5 + $0x20] sm:$0xff]  ;;  %v3980_v4 = vpack.c.bf16 %v2731_v54, %v2730_v3  ;;  %v3492_v3 = vld [vmem:[%s5659_s5 + $0x1d8] sm:$0xff] }
 0x2e1   :  { %3609 = vmatprep.mubr.msk.f32.mxu1 %vm4351_vm4, %v5675_v12  ;;  %v3977_v43 = vpack.c.bf16 %v2729_v16, %v2728_v56  ;;  %v3486_v56 = vld [vmem:[%s5659_s5 + $0x1a8] sm:$0xff] }
 0x2e3   :  { %3966 = vmatpush3.bf16.msra.mxu1 %v3965_v55 }
 0x2e4   :  { %3967 = vmatprep.subr.bf16.mxu1 %v4350_v44 }
 0x2e7   :  { %3969 = vmatpush3.bf16.msra.mxu1 %v3968_v58 }
 0x2e8   :  { %3970 = vmatprep.subr.bf16.mxu1 %v4350_v44 }
 0x397   :  { %v2617_v31 = vpop.f32.mrb[48].mxu1 }
 0x398   :  { %v2692_v26 = vadd.f32 %v2685_v11, %v2617_v31  ;;  %v2619_v6 = vpop.f32.mrb[49].mxu1 }
 0x399   :  { %v2693_v14 = vadd.f32 %v2689_v47, %v2619_v6  ;;  %v2737_v6 = vld [vmem:[%s5659_s5 + $0x68] sm:$0xff] }
 0x39b   :  { %v2708_v36 = vmax.f32 %v2692_v26, %v2693_v14  ;;  %v2623_v27 = vpop.f32.mrb[50].mxu1  ;;  %v2736_v26 = vld [vmem:[%s5659_s5 + $0x60] sm:$0xff] }
 0x39c   :  { %v2694_v37 = vadd.f32 %v2685_v11, %v2623_v27  ;;  %v2625_v52 = vpop.f32.mrb[51].mxu1  ;;  %v3989_v14 = vpack.c.bf16 %v2737_v6, %v2736_v26  ;;  %v2739_v27 = vld [vmem:[%s5659_s5 + $0x78] sm:$0xff]  ;;  %v3087_v6 = vld [vmem:[%s5661_s7 + $0x28] sm:$0xff] }
 0x39d   :  { %v2695_v24 = vadd.f32 %v2689_v47, %v2625_v52  ;;  %v3465_v52 = vld [vmem:[%s5659_s5 + $0x100] sm:$0xff] }
 0x39f   :  { %v2709_v19 = vmax.f32 %v2694_v37, %v2695_v24  ;;  %v2629_v57 = vpop.f32.mrb[52].mxu1  ;;  %v3466_v24 = vld [vmem:[%s5659_s5 + $0x108] sm:$0xff] }
 0x3a0   :  { %v2696_v0 = vadd.f32 %v2685_v11, %v2629_v57  ;;  %v2631_v17 = vpop.f32.mrb[53].mxu1 }
 0x3a1   :  { %v5430_v38 = vmax.f32 %v2708_v36, %v2709_v19  ;;  %v2697_v49 = vadd.f32 %v2689_v47, %v2631_v17  ;;  %v2738_v36 = vld [vmem:[%s5659_s5 + $0x70] sm:$0xff]  ;;  %v3995_v19 = vpack.c.bf16 %v3466_v24, %v3465_v52  ;;  %v3468_v17 = vld [vmem:[%s5659_s5 + $0x118] sm:$0xff] }
 0x3a2   :  { %v3992_v37 = vpack.c.bf16 %v2739_v27, %v2738_v36  ;;  %v3088_v36 = vld [vmem:[%s5661_s7 + $0x30] sm:$0xff]  ;;  %v3089_v27 = vld [vmem:[%s5661_s7 + $0x38] sm:$0xff] }
 0x3a3   :  { %v2710_v51 = vmax.f32 %v2696_v0, %v2697_v49  ;;  %v2635_v34 = vpop.f32.mrb[54].mxu1  ;;  %v2720_v57 = vmax.f32 %v5430_v38, 0.0  ;;  %v3467_v0 = vld [vmem:[%s5659_s5 + $0x110] sm:$0xff]  ;;  %v3469_v38 = vld [vmem:[%s5659_s5 + $0x120] sm:$0xff] }
 0x3a4   :  { %v2698_v61 = vadd.f32 %v2685_v11, %v2635_v34  ;;  %v2637_v7 = vpop.f32.mrb[55].mxu1  ;;  %v3998_v49 = vpack.c.bf16 %v3468_v17, %v3467_v0 }
 0x3a5   :  { %v2699_v39 = vadd.f32 %v2689_v47, %v2637_v7  ;;  %v3472_v7 = vld [vmem:[%s5659_s5 + $0x138] sm:$0xff] }
 0x3a7   :  { %v2711_v32 = vmax.f32 %v2698_v61, %v2699_v39  ;;  %v2641_v20 = vpop.f32.mrb[56].mxu1  ;;  %v3471_v61 = vld [vmem:[%s5659_s5 + $0x130] sm:$0xff] }
 0x3a8   :  { %v2700_v35 = vadd.f32 %v2685_v11, %v2641_v20  ;;  %v2643_v50 = vpop.f32.mrb[57].mxu1  ;;  %v4004_v39 = vpack.c.bf16 %v3472_v7, %v3471_v61  ;;  %v3474_v20 = vld [vmem:[%s5659_s5 + $0x148] sm:$0xff] }
 0x3a9   :  { %v2717_v23 = vmax.f32 %v2710_v51, %v2711_v32  ;;  %v2701_v41 = vadd.f32 %v2689_v47, %v2643_v50  ;;  %v3470_v51 = vld [vmem:[%s5659_s5 + $0x128] sm:$0xff]  ;;  %v3473_v32 = vld [vmem:[%s5659_s5 + $0x140] sm:$0xff] }
 0x3aa   :  { %v4001_v34 = vpack.c.bf16 %v3470_v51, %v3469_v38  ;;  %v4007_v62 = vpack.c.bf16 %v3474_v20, %v3473_v32  ;;  %v3498_v32 = vld [vmem:[%s5662_s8] ss:$0 sm:$0xff] }
 0x3ab   :  { %v2721_v25 = vmax.f32 %v2717_v23, 0.0  ;;  %v2712_v63 = vmax.f32 %v2700_v35, %v2701_v41  ;;  %v2647_v8 = vpop.f32.mrb[58].mxu1  ;;  %v3476_v35 = vld [vmem:[%s5659_s5 + $0x158] sm:$0xff]  ;;  %v3477_v23 = vld [vmem:[%s5659_s5 + $0x160] sm:$0xff]  ;;  %v3478_v41 = vld [vmem:[%s5659_s5 + $0x168] sm:$0xff] }
 0x3ac   :  { %v2702_v48 = vadd.f32 %v2685_v11, %v2647_v8  ;;  %v2649_v1 = vpop.f32.mrb[59].mxu1  ;;  %v4010_v50 = vpack.c.bf16 %v3476_v35, %v3475_v40 }
 0x3ad   :  { %v2703_v29 = vadd.f32 %v2689_v47, %v2649_v1  ;;  %3610 = vmatmul.mubr.f32.vlgmr.msra.gmra.mrb[64].mxu1 %v2721_v25  ;;  %v3479_v25 = vld [vmem:[%s5659_s5 + $0x170] sm:$0xff] }
 0x3ae   :  { %3972 = vmatpush3.bf16.msra.mxu1 %v3971_v53  ;;  %3644 = vmatprep.mubr.msk.f32.mxu1 %vm4351_vm4, %v5675_v12  ;;  %v4013_v53 = vpack.c.bf16 %v3478_v41, %v3477_v23 }
 0x3af   :  { %v2713_v2 = vmax.f32 %v2702_v48, %v2703_v29  ;;  %v2653_v28 = vpop.f32.mrb[60].mxu1  ;;  %3973 = vmatprep.subr.bf16.mxu1 %v4350_v44  ;;  %v4019_v48 = vpack.c.bf16 %v3482_v9, %v3481_v18  ;;  %v3483_v29 = vld [vmem:[%s5659_s5 + $0x190] sm:$0xff] }
 0x3b0   :  { %v2704_v13 = vadd.f32 %v2685_v11, %v2653_v28  ;;  %v2655_v33 = vpop.f32.mrb[61].mxu1  ;;  %v3485_v28 = vld [vmem:[%s5659_s5 + $0x1a0] sm:$0xff] }
 0x3b1   :  { %v5453_v45 = vmax.f32 %v2712_v63, %v2713_v2  ;;  %v2705_v15 = vadd.f32 %v2689_v47, %v2655_v33  ;;  %v3480_v63 = vld [vmem:[%s5659_s5 + $0x178] sm:$0xff]  ;;  %v4025_v16 = vpack.c.bf16 %v3486_v56, %v3485_v28 }
 0x3b2   :  { %3975 = vmatpush3.bf16.msra.mxu1 %v3974_v10  ;;  %v4016_v8 = vpack.c.bf16 %v3480_v63, %v3479_v25  ;;  %v3484_v10 = vld [vmem:[%s5659_s5 + $0x198] sm:$0xff] }
 0x3b3   :  { %v2714_v21 = vmax.f32 %v2704_v13, %v2705_v15  ;;  %v2659_v59 = vpop.f32.mrb[62].mxu1  ;;  %3976 = vmatprep.subr.bf16.mxu1 %v4350_v44  ;;  %v2722_v1 = vmax.f32 %v5453_v45, 0.0  ;;  %v4022_v2 = vpack.c.bf16 %v3484_v10, %v3483_v29  ;;  %v3487_v13 = vld [vmem:[%s5659_s5 + $0x1b0] sm:$0xff]  ;;  %v3488_v33 = vld [vmem:[%s5659_s5 + $0x1b8] sm:$0xff]  ;;  %v3489_v15 = vld [vmem:[%s5659_s5 + $0x1c0] sm:$0xff] }
 0x3b4   :  { %v2706_v60 = vadd.f32 %v2685_v11, %v2659_v59  ;;  %v2661_v55 = vpop.f32.mrb[63].mxu1  ;;  %v2734_v11 = vld [vmem:[%s5659_s5 + $0x50] sm:$0xff]  ;;  %v4028_v45 = vpack.c.bf16 %v3488_v33, %v3487_v13 }
 0x3b5   :  { %v2707_v22 = vadd.f32 %v2689_v47, %v2661_v55  ;;  %v2735_v47 = vld [vmem:[%s5659_s5 + $0x58] sm:$0xff]  ;;  %v3491_v59 = vld [vmem:[%s5659_s5 + $0x1d0] sm:$0xff]  ;;  %v3494_v55 = vld [vmem:[%s5659_s5 + $0x1e8] sm:$0xff] }
 0x3b6   :  { %3978 = vmatpush3.bf16.msra.mxu1 %v3977_v43  ;;  %v3986_v31 = vpack.c.bf16 %v2735_v47, %v2734_v11  ;;  %v3490_v43 = vld [vmem:[%s5659_s5 + $0x1c8] sm:$0xff]  ;;  %v4034_v54 = vpack.c.bf16 %v3492_v3, %v3491_v59  ;;  %v3084_v47 = vld [vmem:[%s5661_s7 + $0x10] sm:$0xff] }
 0x3b7   :  { %v2715_v58 = vmax.f32 %v2706_v60, %v2707_v22  ;;  %3979 = vmatprep.subr.bf16.mxu1 %v4350_v44  ;;  %v3493_v60 = vld [vmem:[%s5659_s5 + $0x1e0] sm:$0xff]  ;;  %v3083_v11 = vld [vmem:[%s5661_s7 + $0x8] sm:$0xff] }
 0x3b8   :  { %v4037_v22 = vpack.c.bf16 %v3494_v55, %v3493_v60 }
 0x3b9   :  { %v5469_v46 = vmax.f32 %v2714_v21, %v2715_v58  ;;  %v4031_v21 = vpack.c.bf16 %v3490_v43, %v3489_v15  ;;  %v3496_v58 = vld [vmem:[%s5659_s5 + $0x1f8] sm:$0xff] }
 0x3ba   :  { %3981 = vmatpush3.bf16.msra.mxu1 %v3980_v4  ;;  %v3495_v4 = vld [vmem:[%s5659_s5 + $0x1f0] sm:$0xff] }
 0x3bb   :  { %3982 = vmatprep.subr.bf16.mxu1 %v4350_v44  ;;  %v4040_v30 = vpack.c.bf16 %v3496_v58, %v3495_v4  ;;  %v2723_v42 = vmax.f32 %v5469_v46, 0.0  ;;  %v3085_v46 = vld [vmem:[%s5661_s7 + $0x18] sm:$0xff] }
 0x3bc   :  { %v4046_v26 = vpack.c.bf16 %v3085_v46, %v3084_v47 }
 0x3be   :  { %3984 = vmatpush3.bf16.msra.mxu1 %v3983_v5  ;;  %v3082_v5 = vld [vmem:[%s5661_s7] sm:$0xff] }
 0x3bf   :  { %3985 = vmatprep.subr.bf16.mxu1 %v4350_v44 }
 0x3c2   :  { %3987 = vmatpush3.bf16.msra.mxu1 %v3986_v31  ;;  %v4043_v31 = vpack.c.bf16 %v3083_v11, %v3082_v5 }
 0x3c3   :  { %3988 = vmatprep.subr.bf16.mxu1 %v4350_v44 }
 0x3c6   :  { %3990 = vmatpush3.bf16.msra.mxu1 %v3989_v14 }
 0x3c7   :  { %3991 = vmatprep.subr.bf16.mxu1 %v4350_v44 }
 0x3ca   :  { %3993 = vmatpush3.bf16.msra.mxu1 %v3992_v37  ;;  %v4052_v37 = vpack.c.bf16 %v3089_v27, %v3088_v36 }
 0x3cb   :  { %3994 = vmatprep.subr.bf16.mxu1 %v4350_v44 }
 0x3cd   :  { %3645 = vmatmul.mubr.f32.vlgmr.msra.gmra.mrb[66].mxu1 %v2720_v57 }
 0x3ce   :  { %3996 = vmatpush3.bf16.msra.mxu1 %v3995_v19  ;;  %3679 = vmatprep.mubr.msk.f32.mxu1 %vm4351_vm4, %v5675_v12 }
 0x3cf   :  { %3997 = vmatprep.subr.bf16.mxu1 %v4350_v44 }
 0x3d2   :  { %3999 = vmatpush3.bf16.msra.mxu1 %v3998_v49 }
 0x3d3   :  { %4000 = vmatprep.subr.bf16.mxu1 %v4350_v44 }
 0x3d6   :  { %4002 = vmatpush3.bf16.msra.mxu1 %v4001_v34 }
 0x3d7   :  { %4003 = vmatprep.subr.bf16.mxu1 %v4350_v44 }
 0x3da   :  { %4005 = vmatpush3.bf16.msra.mxu1 %v4004_v39 }
 0x3db   :  { %4006 = vmatprep.subr.bf16.mxu1 %v4350_v44 }
 0x3de   :  { %4008 = vmatpush3.bf16.msra.mxu1 %v4007_v62 }
 0x3df   :  { %4009 = vmatprep.subr.bf16.mxu1 %v4350_v44 }
 0x3e2   :  { %4011 = vmatpush3.bf16.msra.mxu1 %v4010_v50 }
 0x3e3   :  { %4012 = vmatprep.subr.bf16.mxu1 %v4350_v44 }
 0x3e6   :  { %4014 = vmatpush3.bf16.msra.mxu1 %v4013_v53 }
 0x3e7   :  { %4015 = vmatprep.subr.bf16.mxu1 %v4350_v44 }
 0x3ea   :  { %4017 = vmatpush3.bf16.msra.mxu1 %v4016_v8 }
 0x3eb   :  { %4018 = vmatprep.subr.bf16.mxu1 %v4350_v44 }
 0x3ed   :  { %3680 = vmatmul.mubr.f32.vlgmr.msra.gmra.mrb[68].mxu1 %v2722_v1 }
 0x3ee   :  { %4020 = vmatpush3.bf16.msra.mxu1 %v4019_v48  ;;  %3714 = vmatprep.mubr.msk.f32.mxu1 %vm4351_vm4, %v5675_v12 }
 0x3ef   :  { %4021 = vmatprep.subr.bf16.mxu1 %v4350_v44 }
 0x3f2   :  { %4023 = vmatpush3.bf16.msra.mxu1 %v4022_v2 }
 0x3f3   :  { %4024 = vmatprep.subr.bf16.mxu1 %v4350_v44 }
 0x3f6   :  { %4026 = vmatpush3.bf16.msra.mxu1 %v4025_v16 }
 0x3f7   :  { %4027 = vmatprep.subr.bf16.mxu1 %v4350_v44 }
 0x3fa   :  { %4029 = vmatpush3.bf16.msra.mxu1 %v4028_v45 }
 0x3fb   :  { %4030 = vmatprep.subr.bf16.mxu1 %v4350_v44 }
 0x3fe   :  { %4032 = vmatpush3.bf16.msra.mxu1 %v4031_v21 }
 0x3ff   :  { %4033 = vmatprep.subr.bf16.mxu1 %v4350_v44 }
 0x402   :  { %4035 = vmatpush3.bf16.msra.mxu1 %v4034_v54 }
 0x403   :  { %4036 = vmatprep.subr.bf16.mxu1 %v4350_v44 }
 0x406   :  { %4038 = vmatpush3.bf16.msra.mxu1 %v4037_v22 }
 0x407   :  { %4039 = vmatprep.subr.bf16.mxu1 %v4350_v44 }
 0x40a   :  { %4041 = vmatpush3.bf16.msra.mxu1 %v4040_v30 }
 0x40b   :  { %4042 = vmatprep.subr.bf16.mxu1 %v4350_v44 }
 0x40d   :  { %3715 = vmatmul.mubr.f32.vlgmr.msra.gmra.mrb[70].mxu1 %v2723_v42 }
 0x40e   :  { %3733 = vmatprep.mubr.msk.f32.mxu1 %vm4351_vm4, %v5675_v12  ;;  %4044 = vmatpush3.bf16.msra.mxu1 %v4043_v31  ;;  %v3086_v12 = vld [vmem:[%s5661_s7 + $0x20] sm:$0xff] }
 0x40f   :  { %4045 = vmatprep.subr.bf16.mxu1 %v4350_v44  ;;  %v4049_v14 = vpack.c.bf16 %v3087_v6, %v3086_v12 }
 0x412   :  { %4047 = vmatpush3.bf16.msra.mxu1 %v4046_v26 }
 0x413   :  { %4048 = vmatprep.subr.bf16.mxu1 %v4350_v44 }
 0x416   :  { %4050 = vmatpush3.bf16.msra.mxu1 %v4049_v14 }
 0x417   :  { %4051 = vmatprep.subr.bf16.mxu1 %v4350_v44  ;;  %v3497_v44 = vld [vmem:[%s5660_s6] ss:$0 sm:$0xff] }
 0x41a   :  { %4053 = vmatpush3.bf16.msra.mxu1 %v4052_v37 }
 0x480   :  { %v2823_v52 = vpop.f32.mrb[64].mxu1 }
 0x481   :  { %v3611_v24 = vpop.f32.mrb[65].mxu1 }
 0x4a0   :  { %v2893_v19 = vpop.f32.mrb[66].mxu1 }
 0x4a1   :  { %v2894_v57 = vadd.f32 %v2893_v19, %v2823_v52  ;;  %v3646_v0 = vpop.f32.mrb[67].mxu1 }
 0x4c0   :  { %v2980_v17 = vpop.f32.mrb[68].mxu1 }
 0x4c1   :  { %v2984_v49 = vadd.f32 %v2980_v17, %v2894_v57  ;;  %v3681_v38 = vpop.f32.mrb[69].mxu1 }
 0x4e0   :  { %v3068_v51 = vpop.f32.mrb[70].mxu1 }
 0x4e1   :  { %v3072_v34 = vadd.f32 %v3068_v51, %v2984_v49  ;;  %v3716_v61 = vpop.f32.mrb[71].mxu1 }
 0x4e3   :  { %v3080_v7 = vadd.f32 %v3497_v44, %v3072_v34 }
 0x4e5   :  { %v3081_v39 = vmax.f32 %v3080_v7, 0.0 }
 0x4e7   :  { %3734 = vmatmul.mubr.msk.f32.vlgmr.msra.gmra.mrb[72].mxu1 %vm3097_vm5, %v3081_v39 }
 0x5ba   :  { %v3167_v20 = vpop.f32.mrb[72].mxu1 }
 0x5bb   :  { %v3168_v62 = vadd.f32 %v3498_v32, %v3167_v20  ;;  %v3735_v40 = vpop.f32.mrb[73].mxu1 }
 0x5bd   :  { %v3172_v35 = vsel %vm3171_vm6, %v3168_v62, -inf }
 0x5be   :  { %3173 = vmax.xlane.f32.xlu0 %v3172_v35 }
 0x64b   :  { %v3174_v50 = vpop.xlane.xlu0 %3173 }
 0x64c   :  { %v3175_v23 = vsub.f32 %v3168_v62, %v3174_v50 }
 0x64e   :  { %v3176_v41 = vmul.f32 1.442695, %v3175_v23 }
 0x650   :  { %4317 = vpow2.f32 %v3176_v41 }
 0x65a   :  { %v4318_v53 = vpop.eup %4317 }
 0x65b   :  { %v3178_v25 = vsel %vm3171_vm6, %v4318_v53, 0.0 }
 0x65c   :  { %3179 = vadd.xlane.f32.xlu0 %v3178_v25 }
 0x6e9   :  { %v3180_v63 = vpop.xlane.xlu0 %3179 }
 0x6ea   :  { %4319 = vlog2.f32 %v3180_v63 }
 0x6f4   :  { %v4320_v8 = vpop.eup %4319 }
 0x6f5   :  { %v3182_v18 = vmul.f32 0.6931472, %v4320_v8 }
 0x6f7   :  { %v3183_v9 = vadd.f32 %v3182_v18, %v3174_v50 }
 0x6f9   :  { %v3184_v48 = vsub.f32 %v3168_v62, %v3183_v9 }
 0x6fb   :  { %3185 = vst.msk [vmem:[%s5663_s9] sm:$0xff] %vm3171_vm6, %v3184_v48 }
 0x6fc   :  { %3190 = vsyncpa [#allocation3], 1 }

</bundles_post_ra>
